<compile_context>
chip_gen: v6e
topology: v6e:2x2x1
jax: 0.10.0
libtpu: 0.0.40
codegen_flags: <defaults>
</compile_context>

<pallas_src>
from typing import NamedTuple

import jax
import jax.numpy as jnp
from jax.experimental import pallas as pl
from jax.experimental.pallas import tpu as pltpu

OBS_DIM = 3          # Pendulum-v1 observation space
ACT_DIM = 1          # Pendulum-v1 action space (layer-3 path assumes this)
HIDDEN = 256
MAX_ACTION = 2.0     # float(env.action_space.high[0]) for Pendulum-v1
KPAD = 8             # layer-1 contraction padded to one sublane tile
MAX_TILE_B = 4096    # upper bound on the batch tile (review: sweepable)


def _round_up(n, m):
    return ((n + m - 1) // m) * m


def _cdiv(a, b):
    return (a + b - 1) // b


def _default_elementwise_dtype():
    """bf16 elementwise on v6e/v7x (bf16 VPU/EUP), f32 everywhere else."""
    try:
        kind = jax.devices()[0].device_kind.lower()
    except Exception:  # pragma: no cover - conservative fallback
        return jnp.float32
    if ("v6" in kind) or ("v7" in kind) or ("6e" in kind) or ("7x" in kind):
        return jnp.bfloat16
    return jnp.float32


def _choose_tile_b(batch, max_tile=MAX_TILE_B):
    """Batch tile: multiple of 256 (MXU / lane friendly), capped at max_tile,
    and small enough that >= 2 grid steps exist when the batch allows it so
    v7x's two TensorCores both get work."""
    b256 = _round_up(max(batch, 1), 256)
    num_tiles = _cdiv(b256, max_tile)
    if b256 >= 512:
        num_tiles = max(num_tiles, 2)
    return _round_up(_cdiv(b256, num_tiles), 256)


class PreparedActorParams(NamedTuple):
    w1T: jax.Array   # (HIDDEN, KPAD) bf16; column OBS_DIM carries b1
    w2T: jax.Array   # (HIDDEN, HIDDEN) bf16, (out, in) layout
    b2: jax.Array    # (HIDDEN, 1) elementwise dtype (f32 or bf16)
    w3p: jax.Array   # (8, HIDDEN) bf16; row 0 = w3^T, rows 1..7 zero
    b3: jax.Array    # (1, 1) f32


def actor_kernel(xT_ref, w1T_ref, w2T_ref, b2_ref, w3p_ref, b3_ref, oT_ref):
    # Elementwise dtype is carried by b2: f32 on v5e, bf16 on v6e/v7x.
    ew = b2_ref.dtype

    # --- Layer 1: Linear(obs_dim, 256) + ReLU, on the MXU ---------------------
    # K padded 3 -> 8; x^T row OBS_DIM is 1.0 and w1T column OBS_DIM is b1, so
    # the bias is folded into the matmul.  f32 accumulation.
    h1 = jnp.dot(w1T_ref[...], xT_ref[...], preferred_element_type=jnp.float32)
    h1 = jnp.maximum(h1.astype(ew), 0).astype(jnp.bfloat16)   # (HIDDEN, TILE_B)

    # --- Layer 2: Linear(256, 256) + ReLU (the main matmul) -------------------
    h2 = jnp.dot(w2T_ref[...], h1, preferred_element_type=jnp.float32)
    h2 = jnp.maximum(h2.astype(ew) + b2_ref[...], 0).astype(jnp.bfloat16)

    # --- Layer 3: Linear(256, 1) + Tanh, scaled by max_action -----------------
    # w3 row lives in sublane 0 of an (8, HIDDEN) operand -> one more MXU pass;
    # only result row 0 is meaningful.
    y8 = jnp.dot(w3p_ref[...], h2, preferred_element_type=jnp.float32)
    y = y8[0:1, :] + b3_ref[...]                               # (1, TILE_B) f32
    oT_ref[...] = (jnp.tanh(y) * MAX_ACTION).astype(oT_ref.dtype)


def prepare_params(params, elementwise_dtype=None):
    """One-time preprocessing of Actor parameters into kernel-ready layout
    (hoisted out of actor_forward so per-call work is only the x relayout).

    `params` are stored (in, out): forward is x @ W + b."""
    assert ACT_DIM == 1 and OBS_DIM + 1 <= KPAD
    if elementwise_dtype is None:
        elementwise_dtype = _default_elementwise_dtype()
    w1, b1, w2, b2, w3, b3 = params

    w1T = jnp.zeros((HIDDEN, KPAD), jnp.float32)
    w1T = w1T.at[:, :OBS_DIM].set(w1.T)                 # (out, in)
    w1T = w1T.at[:, OBS_DIM].set(b1.reshape(-1))        # bias column (pairs with ones-row)
    w1T = w1T.astype(jnp.bfloat16)

    w2T = w2.T.astype(jnp.bfloat16)                     # (out, in) for h2^T = w2^T @ h1^T
    b2c = b2.reshape(HIDDEN, 1).astype(elementwise_dtype)

    w3p = jnp.zeros((8, HIDDEN), jnp.float32).at[0, :].set(w3.reshape(-1))
    w3p = w3p.astype(jnp.bfloat16)
    b3m = b3.reshape(1, 1).astype(jnp.float32)

    return PreparedActorParams(w1T=w1T, w2T=w2T, b2=b2c, w3p=w3p, b3=b3m)


def actor_forward(x, prepared: PreparedActorParams, *, max_tile_b=MAX_TILE_B):
    """x: (B, OBS_DIM) float32 -> (B, ACT_DIM) float32."""
    B = x.shape[0]
    tile_b = _choose_tile_b(B, max_tile_b)
    num_tiles = _cdiv(B, tile_b)
    b_pad = num_tiles * tile_b

    # Feature-major input (KPAD, b_pad) in bf16:
    #   rows 0..OBS_DIM-1 = features, row OBS_DIM = 1.0 (layer-1 bias), rest 0.
    ones = jnp.ones((B, 1), x.dtype)
    xp = jnp.concatenate([x, ones], axis=1)                        # (B, OBS_DIM+1)
    xp = jnp.pad(xp, ((0, b_pad - B), (0, KPAD - OBS_DIM - 1)))    # (b_pad, KPAD)
    xT = xp.T.astype(jnp.bfloat16)                                 # (KPAD, b_pad)

    const = lambda shape: pl.BlockSpec(shape, lambda i: (0, 0))    # VMEM-resident weights

    outT = pl.pallas_call(
        actor_kernel,
        out_shape=jax.ShapeDtypeStruct((ACT_DIM, b_pad), jnp.float32),
        grid=(num_tiles,),
        in_specs=[
            pl.BlockSpec((KPAD, tile_b), lambda i: (0, i)),        # x^T: streamed per tile
            const((HIDDEN, KPAD)),                                 # w1^T (+ fused b1)
            const((HIDDEN, HIDDEN)),                               # w2^T (bf16, 128 KiB)
            const((HIDDEN, 1)),                                    # b2 column
            const((8, HIDDEN)),                                    # w3 row (padded to 8)
            const((1, ACT_DIM)),                                   # b3
        ],
        out_specs=pl.BlockSpec((ACT_DIM, tile_b), lambda i: (0, i)),  # lane-dense output
        compiler_params=pltpu.CompilerParams(
            dimension_semantics=("parallel",),      # shard batch tiles across v7x's 2 TCs
            vmem_limit_bytes=32 * 1024 * 1024,      # > v5e's 16 MiB default; within v7x's 64 MiB
        ),
    )(xT, prepared.w1T, prepared.w2T, prepared.b2, prepared.w3p, prepared.b3)

    return outT[:, :B].T                                           # (B, ACT_DIM)


def init_params(key):
    """Deterministic init mimicking PyTorch nn.Linear default (uniform +/- 1/sqrt(fan_in)),
    stored as (in, out) so the forward computes x @ W + b."""
    ks = jax.random.split(key, 6)

    def linear(kw, kb, fan_in, fan_out):
        bound = 1.0 / jnp.sqrt(float(fan_in))
        w = jax.random.uniform(kw, (fan_in, fan_out), jnp.float32, -bound, bound)
        b = jax.random.uniform(kb, (1, fan_out), jnp.float32, -bound, bound)
        return w, b

    w1, b1 = linear(ks[0], ks[1], OBS_DIM, HIDDEN)
    w2, b2 = linear(ks[2], ks[3], HIDDEN, HIDDEN)
    w3, b3 = linear(ks[4], ks[5], HIDDEN, ACT_DIM)
    return (w1, b1, w2, b2, w3, b3)


def actor_reference(x, params):
    """Pure-JAX f32 reference of the original module."""
    w1, b1, w2, b2, w3, b3 = params
    h1 = jnp.maximum(x @ w1 + b1, 0.0)
    h2 = jnp.maximum(h1 @ w2 + b2, 0.0)
    return jnp.tanh(h2 @ w3 + b3) * MAX_ACTION


if __name__ == "__main__":
    key = jax.random.PRNGKey(0)
    k_params, k_x = jax.random.split(key)

    params = init_params(k_params)
    prepared = prepare_params(params)        # one-time weight relayout / bf16 cast

    batch = 1000                             # non-multiple -> exercises padding; 2 tiles of 512
    x = jax.random.normal(k_x, (batch, OBS_DIM), jnp.float32)

    out = jax.block_until_ready(actor_forward(x, prepared))
    ref = actor_reference(x, params)

    assert out.shape == (batch, ACT_DIM)
    # bf16 MXU operands on all 3 layers (f32 accumulation) -> loosened tolerance vs f32 ref.
    err = float(jnp.max(jnp.abs(out - ref)))
    assert err < 6e-2, err
    assert bool(jnp.all(jnp.abs(out) <= MAX_ACTION + 1e-6))

    print("KERNEL_OK")
</pallas_src>

<mosaic_0001>
module attributes {stable_mosaic.version = 11 : i64} {
  func.func @actor_kernel(%arg0: i32, %arg1: memref<8x512xbf16, #tpu.memory_space<vmem>>, %arg2: memref<256x8xbf16, #tpu.memory_space<vmem>>, %arg3: memref<256x256xbf16, #tpu.memory_space<vmem>>, %arg4: memref<256x1xf32, #tpu.memory_space<vmem>>, %arg5: memref<8x256xbf16, #tpu.memory_space<vmem>>, %arg6: memref<1x1xf32, #tpu.memory_space<vmem>>, %arg7: memref<1x512xf32, #tpu.memory_space<vmem>>) attributes {dimension_semantics = [#tpu.dimension_semantics<parallel>], iteration_bounds = array<i64: 2>, scalar_prefetch = 0 : i64, scratch_operands = 0 : i64, tpu.core_type = #tpu.core_type<tc>, window_params = [{transform_indices = @transform_0, window_bounds = array<i64: 8, 512>}, {pipeline_mode = #tpu.pipeline_mode<synchronous>, transform_indices = @transform_1, window_bounds = array<i64: 256, 8>}, {pipeline_mode = #tpu.pipeline_mode<synchronous>, transform_indices = @transform_2, window_bounds = array<i64: 256, 256>}, {pipeline_mode = #tpu.pipeline_mode<synchronous>, transform_indices = @transform_3, window_bounds = array<i64: 256, 1>}, {pipeline_mode = #tpu.pipeline_mode<synchronous>, transform_indices = @transform_4, window_bounds = array<i64: 8, 256>}, {pipeline_mode = #tpu.pipeline_mode<synchronous>, transform_indices = @transform_5, window_bounds = array<i64: 1, 1>}, {transform_indices = @transform_6, window_bounds = array<i64: 1, 512>}]} {
    %c0 = arith.constant 0 : index
    %c0_0 = arith.constant 0 : index
    %0 = vector.load %arg2[%c0, %c0_0] : memref<256x8xbf16, #tpu.memory_space<vmem>>, vector<256x8xbf16>
    %c0_1 = arith.constant 0 : index
    %c0_2 = arith.constant 0 : index
    %1 = vector.load %arg1[%c0_1, %c0_2] : memref<8x512xbf16, #tpu.memory_space<vmem>>, vector<8x512xbf16>
    %cst = arith.constant dense<0.000000e+00> : vector<256x512xf32>
    %2 = tpu.matmul %0, %1, %cst {dimension_numbers = #tpu.dot_dimension_numbers<[1], [0], [0], [1], [0, 0, 1, 1], [], []>} : vector<256x8xbf16>, vector<8x512xbf16>, vector<256x512xf32> -> vector<256x512xf32>
    %cst_3 = arith.constant 0.000000e+00 : f32
    %3 = vector.broadcast %cst_3 : f32 to vector<256x512xf32>
    %4 = arith.maximumf %2, %3 : vector<256x512xf32>
    %5 = arith.truncf %4 : vector<256x512xf32> to vector<256x512xbf16>
    %c0_4 = arith.constant 0 : index
    %c0_5 = arith.constant 0 : index
    %6 = vector.load %arg3[%c0_4, %c0_5] : memref<256x256xbf16, #tpu.memory_space<vmem>>, vector<256x256xbf16>
    %cst_6 = arith.constant dense<0.000000e+00> : vector<256x512xf32>
    %7 = tpu.matmul %6, %5, %cst_6 {dimension_numbers = #tpu.dot_dimension_numbers<[1], [0], [0], [1], [0, 0, 1, 1], [], []>} : vector<256x256xbf16>, vector<256x512xbf16>, vector<256x512xf32> -> vector<256x512xf32>
    %c0_7 = arith.constant 0 : index
    %c0_8 = arith.constant 0 : index
    %8 = vector.load %arg4[%c0_7, %c0_8] : memref<256x1xf32, #tpu.memory_space<vmem>>, vector<256x1xf32>
    %9 = vector.broadcast %8 : vector<256x1xf32> to vector<256x512xf32>
    %10 = arith.addf %7, %9 : vector<256x512xf32>
    %cst_9 = arith.constant 0.000000e+00 : f32
    %11 = vector.broadcast %cst_9 : f32 to vector<256x512xf32>
    %12 = arith.maximumf %10, %11 : vector<256x512xf32>
    %13 = arith.truncf %12 : vector<256x512xf32> to vector<256x512xbf16>
    %c0_10 = arith.constant 0 : index
    %c0_11 = arith.constant 0 : index
    %14 = vector.load %arg5[%c0_10, %c0_11] : memref<8x256xbf16, #tpu.memory_space<vmem>>, vector<8x256xbf16>
    %cst_12 = arith.constant dense<0.000000e+00> : vector<8x512xf32>
    %15 = tpu.matmul %14, %13, %cst_12 {dimension_numbers = #tpu.dot_dimension_numbers<[1], [0], [0], [1], [0, 0, 1, 1], [], []>} : vector<8x256xbf16>, vector<256x512xbf16>, vector<8x512xf32> -> vector<8x512xf32>
    %16 = vector.extract_strided_slice %15 {offsets = [0, 0], sizes = [1, 512], strides = [1, 1]} : vector<8x512xf32> to vector<1x512xf32>
    %c0_13 = arith.constant 0 : index
    %c0_14 = arith.constant 0 : index
    %17 = vector.load %arg6[%c0_13, %c0_14] : memref<1x1xf32, #tpu.memory_space<vmem>>, vector<1x1xf32>
    %18 = vector.broadcast %17 : vector<1x1xf32> to vector<1x512xf32>
    %19 = arith.addf %16, %18 : vector<1x512xf32>
    %20 = math.tanh %19 : vector<1x512xf32>
    %cst_15 = arith.constant 2.000000e+00 : f32
    %21 = vector.broadcast %cst_15 : f32 to vector<1x512xf32>
    %22 = arith.mulf %20, %21 : vector<1x512xf32>
    %c0_16 = arith.constant 0 : index
    %c0_17 = arith.constant 0 : index
    %23 = vector.load %arg7[%c0_16, %c0_17] : memref<1x512xf32, #tpu.memory_space<vmem>>, vector<1x512xf32>
    tpu.vector_store %arg7[%c0_16, %c0_17], %22 {strides = array<i32>} : memref<1x512xf32, #tpu.memory_space<vmem>>, vector<1x512xf32>,
    return
  }
  func.func @transform_0(%arg0: i32) -> (i32, i32) {
    %c0_i32 = arith.constant 0 : i32
    %c0_i32_0 = arith.constant 0 : i32
    return %c0_i32, %arg0 : i32, i32
  }
  func.func @transform_1(%arg0: i32) -> (i32, i32) {
    %c0_i32 = arith.constant 0 : i32
    %c0_i32_0 = arith.constant 0 : i32
    %c0_i32_1 = arith.constant 0 : i32
    return %c0_i32, %c0_i32_0 : i32, i32
  }
  func.func @transform_2(%arg0: i32) -> (i32, i32) {
    %c0_i32 = arith.constant 0 : i32
    %c0_i32_0 = arith.constant 0 : i32
    %c0_i32_1 = arith.constant 0 : i32
    return %c0_i32, %c0_i32_0 : i32, i32
  }
  func.func @transform_3(%arg0: i32) -> (i32, i32) {
    %c0_i32 = arith.constant 0 : i32
    %c0_i32_0 = arith.constant 0 : i32
    %c0_i32_1 = arith.constant 0 : i32
    return %c0_i32, %c0_i32_0 : i32, i32
  }
  func.func @transform_4(%arg0: i32) -> (i32, i32) {
    %c0_i32 = arith.constant 0 : i32
    %c0_i32_0 = arith.constant 0 : i32
    %c0_i32_1 = arith.constant 0 : i32
    return %c0_i32, %c0_i32_0 : i32, i32
  }
  func.func @transform_5(%arg0: i32) -> (i32, i32) {
    %c0_i32 = arith.constant 0 : i32
    %c0_i32_0 = arith.constant 0 : i32
    %c0_i32_1 = arith.constant 0 : i32
    return %c0_i32, %c0_i32_0 : i32, i32
  }
  func.func @transform_6(%arg0: i32) -> (i32, i32) {
    %c0_i32 = arith.constant 0 : i32
    %c0_i32_0 = arith.constant 0 : i32
    return %c0_i32, %arg0 : i32, i32
  }
}

</mosaic_0001>

<bundles_post_ra>
// kernel: tpu_custom_call.1
= control target key start
LH: loop header
LB: loop body
LE: loop exit
PB: predicated region body
PF: predicated region fallthrough
CT: control target
= control target key end

     0   :  { %s3637_s0 = inlined_call_operand.vmem [shape: bf16[8,1024], index: 0, kind: input, shape index: {}]   ;;  %s3638_s1 = inlined_call_operand.vmem [shape: bf16[256,8], index: 1, kind: input, shape index: {}]   ;;  %s3639_s2 = inlined_call_operand.vmem [shape: bf16[256,256], index: 2, kind: input, shape index: {}]   ;;  %s3640_s3 = inlined_call_operand.vmem [shape: f32[256,1], index: 3, kind: input, shape index: {}]   ;;  %s3641_s4 = inlined_call_operand.vmem [shape: bf16[8,256], index: 4, kind: input, shape index: {}]   ;;  %s3642_s5 = inlined_call_operand.<no memory space> [shape: f32[1,1], index: 5, kind: input, shape index: {}]   ;;  %s3643_s6 = inlined_call_operand.hbm [shape: f32[1,1024], index: 6, kind: output, shape index: {}]  }
   0x1   :  { %v11_v0 = vstv %s3642_s5 }
   0x2   :  { %12 = vst [vmem:[#allocation2] sm:$0x1] %v11_v0 }
   0x3   :  { %13 = vsyncpa [#allocation4], 0 }
   0x4   :  { %15 = vsyncpa [#allocation4 + $0x1], 0  ;;  %s2527_s23 = smov 0   ;;  %s2529_s24 = smov 0  }
   0x5   :  { %s2531_s25 = smov 0   ;;  %s2533_s26 = smov 0  }
   0x6 LB: > { %s2548_s5 = sadd.s32 4294967295, %s2484_s26   ;;  %s2202_s27 = sadd.s32 4294967294, %s2484_s26   ;;  %s2484_s26 = sphi %s2533_s26, %s3832_s26   ;;  %s2480_s25 = sphi %s2531_s25, %s3831_s25   ;;  %s2476_s24 = sphi %s2529_s24, %s3830_s24   ;;  %s2472_s23 = sphi %s2527_s23, %s3829_s23  }
   0x7   : > { %s2552_s28 = sadd.s32 1, %s2484_s26   ;;  %s159_s29 = sadd.s32 1, %s2480_s25 }
   0x8   : > { %s156_s30 = ssub.s32 %s2484_s26, %s2552_s28  ;;  %p169_p0 = scmp.ne.s32.totalorder %s2480_s25, %s2476_s24 }
   0x9   : > { %p157_p1 = scmp.eq.s32.totalorder %s156_s30, 0  ;;  %p170_p2 = scmp.eq.s32.totalorder %s2548_s5, 1 }
   0xa   : > { %p175_p3 = scmp.ne.s32.totalorder %s2476_s24, %s2472_s23  ;;  %p176_p4 = scmp.eq.s32.totalorder %s2202_s27, 1 }
   0xb   : > { %s2563_s7 = scalar_select %p157_p1, %s2480_s25, %s159_s29  }
   0xc   : > { %p2565_p5 = por %p170_p2, %p169_p0  ;;  %p2569_p6 = por %p176_p4, %p175_p3 }
   0xd   : > { %p2205_p7 = scmp.ge.s32.totalorder %s2484_s26, 1  ;;  %p218_p8 = scmp.lt.s32.totalorder %s2484_s26, 3 }
   0xf   : > { %p219_p9 = pnand %p2205_p7, %p218_p8 }
  0x11   : > { %222 = sbr.rel (%p219_p9) target bundleno = 982 (0x3d6), region = 44 }
  0x16   : > { %s2207_s10 = sshll.u32 %s2548_s5, 2  ;;  %v2486_v1 = vmov 0   ;;  %vm429_vm0 = vcmask 1043456   ;;  %v2350_v10 = vld [vmem:[%s3638_s1] sm:$0xff]   ;;  %vm380_vm1 = vcmask 64512   ;;  %v2351_v11 = vld [vmem:[%s3638_s1 + $0x8] sm:$0xff]  }
  0x17   : > { %p249_p10 = scmp.lt.s32.totalorder %s2207_s10, 7  ;;  %474 = vmatprep.mubr.bf16.mxu0 %v2486_v1  ;;  %667 = vmatprep.mubr.bf16.mxu1 %v2486_v1  ;;  %v2352_v12 = vld [vmem:[%s3638_s1 + $0x10] sm:$0xff]   ;;  %v2353_v13 = vld [vmem:[%s3638_s1 + $0x18] sm:$0xff]   ;;  %v2354_v14 = vld [vmem:[%s3638_s1 + $0x20] sm:$0xff]   ;;  %s245_s17 = sand.u32 1, %s2476_s24  }
  0x18   : > { %2344 = vset.pattern.permute.xlu0 %v2486_v1  ;;  %2345 = vset.pattern.permute.xlu1 %v2486_v1  ;;  %v2355_v15 = vld [vmem:[%s3638_s1 + $0x28] sm:$0xff]   ;;  %v2356_v16 = vld [vmem:[%s3638_s1 + $0x30] sm:$0xff]   ;;  %v2357_v17 = vld [vmem:[%s3638_s1 + $0x38] sm:$0xff]   ;;  %s2206_s18 = sshll.u32 %s245_s17, 2  ;;  %s2302_s19 = sshll.u32 %s2548_s5, 6 }
  0x19   : > { %s3834_s10 = smov (!%p249_p10, %s2207_s10), 7  ;;  %v2358_v18 = vld [vmem:[%s3638_s1 + $0x40] sm:$0xff]   ;;  %v2359_v19 = vld [vmem:[%s3638_s1 + $0x48] sm:$0xff]   ;;  %v2360_v20 = vld [vmem:[%s3638_s1 + $0x50] sm:$0xff]   ;;  %s247_s20 = scalar_lea.vmem [#allocation3], %s2206_s18 }
  0x1a   : > { %s2208_s11 = sshll.u32 %s3834_s10, 2  ;;  %v2361_v21 = vld [vmem:[%s3638_s1 + $0x58] sm:$0xff]   ;;  %v2362_v22 = vld [vmem:[%s3638_s1 + $0x60] sm:$0xff]   ;;  %v2363_v23 = vld [vmem:[%s3638_s1 + $0x68] sm:$0xff]   ;;  %s2143_s21 = sshll.u32 %s247_s20, 4  ;;  %s2144_s21 = int_to_ptr.vmem [resolvable:$true] %s2143_s21 }
  0x1b   : > { %s252_s14 = scalar_lea.vmem %s3637_s0, %s2208_s11  ;;  %v2364_v24 = vld [vmem:[%s3638_s1 + $0x70] sm:$0xff]   ;;  %v2365_v25 = vld [vmem:[%s3638_s1 + $0x78] sm:$0xff]   ;;  %s2141_s29 = scalar_lea.hbm %s3643_s6, %s2302_s19 }
  0x1c   : > { %v288_v2 = vld [vmem:[%s252_s14] sm:$0xff]  ;;  %v289_v3 = vld [vmem:[%s252_s14 + $0x8] sm:$0xff]  ;;  %s2129_s30 = scalar_lea.sflag [#allocation4], %s245_s17  ;;  %s2424_s10 = scalar_lea.vmem %s2144_s21, 64 }
  0x1d   : > { %v2226_v4 = vcombine.high %v288_v2, %v288_v2  ;;  %v2228_v5 = vcombine.high %v289_v3, %v289_v3  ;;  %v2225_v6 = vcombine.low %v288_v2, %v288_v2  ;;  %v2227_v7 = vcombine.low %v289_v3, %v289_v3  ;;  %p2425_p11 = scmp.ne.s32.totalorder %s2144_s21, %s2424_s10  ;;  %s2488_s11 = smov [#allocation3]  }
  0x1e   : > { %s2428_s12 = sshll.u32 %s2488_s11, 4  ;;  %s2429_s12 = int_to_ptr.vmem [resolvable:$false] %s2428_s12 }
  0x1f   : > { %2229 = vmatprep.subr.msk.bf16.mxu0 %vm429_vm0, %v2226_v4  ;;  %2246 = vmatprep.subr.msk.bf16.mxu1 %vm429_vm0, %v2228_v5  ;;  %v431_v8 = vsel %vm429_vm0, %v2225_v6, 0  ;;  %v437_v9 = vsel %vm429_vm0, %v2227_v7, 0  ;;  %p2426_p12 = pnand %p2425_p11, %p2565_p5  ;;  %s2430_s5 = scalar_lea.vmem %s2429_s12, 128 }
  0x20   : > { %457 = vmatpush1.bf16.msra.mxu0 %v431_v8  ;;  %650 = vmatpush1.bf16.msra.mxu1 %v437_v9  ;;  %v2368_v8 = vld [vmem:[%s3639_s2 + $0x4] ss:$8 sps:$4 sm:$0xff]   ;;  %p2431_p0 = scmp.lt.s32.totalorder %s2144_s21, %s2429_s12  ;;  %p2432_p1 = scmp.lt.s32.totalorder %s2430_s5, %s2424_s10 }
  0x21   : > { %p2427_p13 = pneg %p2426_p12 }
  0x22   : > { %p2433_p2 = por %p2432_p1, %p2431_p0 }
  0x23   : > { %2230 = vmatmul.mubr.msk.bf16.vlgmr.msra.gmra.mxu0 %vm380_vm1, %v2350_v10  ;;  %2247 = vmatmul.mubr.msk.bf16.vlgmr.msra.gmra.mxu1 %vm380_vm1, %v2350_v10 }
  0x24   : > { %484 = vmatprep.mubr.bf16.mxu0 %v2486_v1  ;;  %677 = vmatprep.mubr.bf16.mxu1 %v2486_v1  ;;  %p2434_p3 = pnand %p2433_p2, %p2427_p13 }
  0x2b   : > { %2231 = vmatmul.mubr.msk.bf16.gmra.mxu0 %vm380_vm1, %v2351_v11  ;;  %2248 = vmatmul.mubr.msk.bf16.gmra.mxu1 %vm380_vm1, %v2351_v11 }
  0x2c   : > { %494 = vmatprep.mubr.bf16.mxu0 %v2486_v1  ;;  %687 = vmatprep.mubr.bf16.mxu1 %v2486_v1 }
  0x33   : > { %2232 = vmatmul.mubr.msk.bf16.gmra.mxu0 %vm380_vm1, %v2352_v12  ;;  %2249 = vmatmul.mubr.msk.bf16.gmra.mxu1 %vm380_vm1, %v2352_v12 }
  0x34   : > { %504 = vmatprep.mubr.bf16.mxu0 %v2486_v1  ;;  %697 = vmatprep.mubr.bf16.mxu1 %v2486_v1 }
  0x3b   : > { %2233 = vmatmul.mubr.msk.bf16.gmra.mxu0 %vm380_vm1, %v2353_v13  ;;  %2250 = vmatmul.mubr.msk.bf16.gmra.mxu1 %vm380_vm1, %v2353_v13 }
  0x3c   : > { %514 = vmatprep.mubr.bf16.mxu0 %v2486_v1  ;;  %707 = vmatprep.mubr.bf16.mxu1 %v2486_v1 }
  0x43   : > { %2234 = vmatmul.mubr.msk.bf16.gmra.mxu0 %vm380_vm1, %v2354_v14  ;;  %2251 = vmatmul.mubr.msk.bf16.gmra.mxu1 %vm380_vm1, %v2354_v14 }
  0x44   : > { %524 = vmatprep.mubr.bf16.mxu0 %v2486_v1  ;;  %717 = vmatprep.mubr.bf16.mxu1 %v2486_v1 }
  0x4b   : > { %2235 = vmatmul.mubr.msk.bf16.gmra.mxu0 %vm380_vm1, %v2355_v15  ;;  %2252 = vmatmul.mubr.msk.bf16.gmra.mxu1 %vm380_vm1, %v2355_v15 }
  0x4c   : > { %534 = vmatprep.mubr.bf16.mxu0 %v2486_v1  ;;  %727 = vmatprep.mubr.bf16.mxu1 %v2486_v1 }
  0x53   : > { %2236 = vmatmul.mubr.msk.bf16.gmra.mxu0 %vm380_vm1, %v2356_v16  ;;  %2253 = vmatmul.mubr.msk.bf16.gmra.mxu1 %vm380_vm1, %v2356_v16 }
  0x54   : > { %544 = vmatprep.mubr.bf16.mxu0 %v2486_v1  ;;  %737 = vmatprep.mubr.bf16.mxu1 %v2486_v1 }
  0x5b   : > { %2237 = vmatmul.mubr.msk.bf16.gmra.mxu0 %vm380_vm1, %v2357_v17  ;;  %2254 = vmatmul.mubr.msk.bf16.gmra.mxu1 %vm380_vm1, %v2357_v17 }
  0x5c   : > { %554 = vmatprep.mubr.bf16.mxu0 %v2486_v1  ;;  %747 = vmatprep.mubr.bf16.mxu1 %v2486_v1 }
  0x63   : > { %2238 = vmatmul.mubr.msk.bf16.gmra.mxu0 %vm380_vm1, %v2358_v18  ;;  %2255 = vmatmul.mubr.msk.bf16.gmra.mxu1 %vm380_vm1, %v2358_v18 }
  0x64   : > { %564 = vmatprep.mubr.bf16.mxu0 %v2486_v1  ;;  %757 = vmatprep.mubr.bf16.mxu1 %v2486_v1 }
  0x6b   : > { %2239 = vmatmul.mubr.msk.bf16.gmra.mxu0 %vm380_vm1, %v2359_v19  ;;  %2256 = vmatmul.mubr.msk.bf16.gmra.mxu1 %vm380_vm1, %v2359_v19 }
  0x6c   : > { %574 = vmatprep.mubr.bf16.mxu0 %v2486_v1  ;;  %767 = vmatprep.mubr.bf16.mxu1 %v2486_v1 }
  0x73   : > { %2240 = vmatmul.mubr.msk.bf16.gmra.mxu0 %vm380_vm1, %v2360_v20  ;;  %2257 = vmatmul.mubr.msk.bf16.gmra.mxu1 %vm380_vm1, %v2360_v20 }
  0x74   : > { %584 = vmatprep.mubr.bf16.mxu0 %v2486_v1  ;;  %777 = vmatprep.mubr.bf16.mxu1 %v2486_v1 }
  0x7b   : > { %2241 = vmatmul.mubr.msk.bf16.gmra.mxu0 %vm380_vm1, %v2361_v21  ;;  %2258 = vmatmul.mubr.msk.bf16.gmra.mxu1 %vm380_vm1, %v2361_v21 }
  0x7c   : > { %594 = vmatprep.mubr.bf16.mxu0 %v2486_v1  ;;  %787 = vmatprep.mubr.bf16.mxu1 %v2486_v1 }
  0x83   : > { %2242 = vmatmul.mubr.msk.bf16.gmra.mxu0 %vm380_vm1, %v2362_v22  ;;  %2259 = vmatmul.mubr.msk.bf16.gmra.mxu1 %vm380_vm1, %v2362_v22 }
  0x84   : > { %604 = vmatprep.mubr.bf16.mxu0 %v2486_v1  ;;  %797 = vmatprep.mubr.bf16.mxu1 %v2486_v1 }
  0x8b   : > { %2243 = vmatmul.mubr.msk.bf16.gmra.mxu0 %vm380_vm1, %v2363_v23  ;;  %2260 = vmatmul.mubr.msk.bf16.gmra.mxu1 %vm380_vm1, %v2363_v23 }
  0x8c   : > { %614 = vmatprep.mubr.bf16.mxu0 %v2486_v1  ;;  %807 = vmatprep.mubr.bf16.mxu1 %v2486_v1 }
  0x93   : > { %2244 = vmatmul.mubr.msk.bf16.gmra.mxu0 %vm380_vm1, %v2364_v24  ;;  %2261 = vmatmul.mubr.msk.bf16.gmra.mxu1 %vm380_vm1, %v2364_v24 }
  0x94   : > { %624 = vmatprep.mubr.bf16.mxu0 %v2486_v1  ;;  %817 = vmatprep.mubr.bf16.mxu1 %v2486_v1 }
  0x9b   : > { %2245 = vmatmul.mubr.msk.bf16.gmra.mxu0 %vm380_vm1, %v2365_v25  ;;  %2262 = vmatmul.mubr.msk.bf16.gmra.mxu1 %vm380_vm1, %v2365_v25 }
  0x9c   : > { %1436 = vmatprep.mubr.bf16.mxu0 %v2368_v8  ;;  %1629 = vmatprep.mubr.bf16.mxu1 %v2368_v8 }
  0xe3   : > { %v476_v26 = vpop.f32.mrf.mxu0  ;;  %v669_v27 = vpop.f32.mrf.mxu1 }
  0xe4   : > { %v828_v32 = vmax.f32 %v476_v26, 0.0  ;;  %v830_v33 = vmax.f32 %v669_v27, 0.0 }
  0xe5   : > { %v2693_v28 = vpop.f32.mrf.mxu0  ;;  %v2695_v29 = vpop.f32.mrf.mxu1 }
  0xe6   : > { %3666 = vst [vmem:[#allocation6_spill] sm:$0xff] %v2693_v28  ;;  %3667 = vst [vmem:[#allocation7_spill] sm:$0xff] %v2695_v29 }
  0xe7   : > { %v480_v30 = vpop.f32.mrf.mxu0  ;;  %v673_v31 = vpop.f32.mrf.mxu1 }
  0xe8   : > { %v832_v34 = vmax.f32 %v480_v30, 0.0  ;;  %v834_v35 = vmax.f32 %v673_v31, 0.0 }
  0xe9   : > { %v2697_v36 = vpop.f32.mrf.mxu0  ;;  %v2699_v37 = vpop.f32.mrf.mxu1 }
  0xea   : > { %3668 = vst [vmem:[#allocation8_spill] sm:$0xff] %v2697_v36  ;;  %3669 = vst [vmem:[#allocation9_spill] sm:$0xff] %v2699_v37  ;;  %v2701_v38 = vpack.c.bf16 %v832_v34, %v828_v32  ;;  %v2703_v39 = vpack.c.bf16 %v834_v35, %v830_v33 }
  0xeb   : > { %v486_v40 = vpop.f32.mrf.mxu0  ;;  %v679_v41 = vpop.f32.mrf.mxu1 }
  0xec   : > { %3670 = vst [vmem:[#allocation10_spill] sm:$0xff] %v2701_v38  ;;  %3671 = vst [vmem:[#allocation11_spill] sm:$0xff] %v2703_v39  ;;  %v836_v46 = vmax.f32 %v486_v40, 0.0  ;;  %v838_v47 = vmax.f32 %v679_v41, 0.0 }
  0xed   : > { %v2705_v42 = vpop.f32.mrf.mxu0  ;;  %v2707_v43 = vpop.f32.mrf.mxu1 }
  0xee   : > { %3672 = vst [vmem:[#allocation12_spill] sm:$0xff] %v2705_v42  ;;  %3673 = vst [vmem:[#allocation13_spill] sm:$0xff] %v2707_v43 }
  0xef   : > { %v490_v44 = vpop.f32.mrf.mxu0  ;;  %v683_v45 = vpop.f32.mrf.mxu1 }
  0xf0   : > { %v840_v48 = vmax.f32 %v490_v44, 0.0  ;;  %v842_v49 = vmax.f32 %v683_v45, 0.0 }
  0xf1   : > { %v2709_v50 = vpop.f32.mrf.mxu0  ;;  %v2711_v51 = vpop.f32.mrf.mxu1 }
  0xf2   : > { %v2713_v52 = vpack.c.bf16 %v840_v48, %v836_v46  ;;  %v2715_v53 = vpack.c.bf16 %v842_v49, %v838_v47 }
  0xf3   : > { %v2717_v54 = vpop.f32.mrf.mxu0  ;;  %v2719_v55 = vpop.f32.mrf.mxu1 }
  0xf4   : > { %3674 = vst [vmem:[#allocation14_spill] sm:$0xff] %v2713_v52  ;;  %3675 = vst [vmem:[#allocation15_spill] sm:$0xff] %v2715_v53 }
  0xf5   : > { %3676 = vst [vmem:[#allocation16_spill] sm:$0xff] %v2717_v54  ;;  %3677 = vst [vmem:[#allocation17_spill] sm:$0xff] %v2719_v55  ;;  %v2721_v56 = vpop.f32.mrf.mxu0  ;;  %v2723_v57 = vpop.f32.mrf.mxu1 }
  0xf7   : > { %v2725_v58 = vpop.f32.mrf.mxu0  ;;  %v2727_v59 = vpop.f32.mrf.mxu1 }
  0xf9   : > { %v2729_v60 = vpop.f32.mrf.mxu0  ;;  %v2731_v61 = vpop.f32.mrf.mxu1 }
  0xfa   : > { %3678 = vst [vmem:[#allocation18_spill] sm:$0xff] %v2729_v60  ;;  %3679 = vst [vmem:[#allocation19_spill] sm:$0xff] %v2731_v61 }
  0xfb   : > { %v2733_v62 = vpop.f32.mrf.mxu0  ;;  %v2735_v63 = vpop.f32.mrf.mxu1 }
  0xfd   : > { %v2737_v0 = vpop.f32.mrf.mxu0  ;;  %v2739_v1 = vpop.f32.mrf.mxu1 }
  0xff   : > { %v2741_v2 = vpop.f32.mrf.mxu0  ;;  %v2743_v3 = vpop.f32.mrf.mxu1 }
 0x101   : > { %v2745_v4 = vpop.f32.mrf.mxu0  ;;  %v2747_v5 = vpop.f32.mrf.mxu1 }
 0x103   : > { %v2749_v6 = vpop.f32.mrf.mxu0  ;;  %v2751_v7 = vpop.f32.mrf.mxu1 }
 0x105   : > { %v2756_v9 = vpop.f32.mrf.mxu0  ;;  %v2758_v10 = vpop.f32.mrf.mxu1 }
 0x107   : > { %v2760_v11 = vpop.f32.mrf.mxu0  ;;  %v2762_v12 = vpop.f32.mrf.mxu1 }
 0x109   : > { %v2764_v13 = vpop.f32.mrf.mxu0  ;;  %v2766_v14 = vpop.f32.mrf.mxu1 }
 0x10b   : > { %v2768_v15 = vpop.f32.mrf.mxu0  ;;  %v2770_v16 = vpop.f32.mrf.mxu1 }
 0x10d   : > { %v528_v17 = vpop.f32.mrf.mxu0  ;;  %v721_v18 = vpop.f32.mrf.mxu1 }
 0x10e   : > { %v869_v39 = vmax.f32 %v528_v17, 0.0  ;;  %v871_v38 = vmax.f32 %v721_v18, 0.0 }
 0x10f   : > { %v2772_v19 = vpop.f32.mrf.mxu0  ;;  %v2774_v20 = vpop.f32.mrf.mxu1 }
 0x111   : > { %v532_v21 = vpop.f32.mrf.mxu0  ;;  %v725_v22 = vpop.f32.mrf.mxu1 }
 0x112   : > { %v873_v42 = vmax.f32 %v532_v21, 0.0  ;;  %v875_v46 = vmax.f32 %v725_v22, 0.0  ;;  %v874_v21 = vmax.f32 %v2774_v20, 0.0 }
 0x113   : > { %v2776_v23 = vpop.f32.mrf.mxu0  ;;  %v2778_v24 = vpop.f32.mrf.mxu1 }
 0x115   : > { %v538_v25 = vpop.f32.mrf.mxu0  ;;  %v731_v26 = vpop.f32.mrf.mxu1 }
 0x116   : > { %v877_v60 = vmax.f32 %v538_v25, 0.0  ;;  %v879_v8 = vmax.f32 %v731_v26, 0.0  ;;  %v977_v25 = vpack.c.bf16 %v873_v42, %v869_v39  ;;  %v979_v26 = vpack.c.bf16 %v875_v46, %v871_v38 }
 0x117   : > { %v2780_v27 = vpop.f32.mrf.mxu0  ;;  %v2782_v30 = vpop.f32.mrf.mxu1 }
 0x119   : > { %v542_v31 = vpop.f32.mrf.mxu0  ;;  %v735_v32 = vpop.f32.mrf.mxu1 }
 0x11a   : > { %v881_v53 = vmax.f32 %v542_v31, 0.0  ;;  %v883_v52 = vmax.f32 %v735_v32, 0.0  ;;  %v880_v31 = vmax.f32 %v2780_v27, 0.0  ;;  %v882_v32 = vmax.f32 %v2782_v30, 0.0 }
 0x11b   : > { %v546_v33 = vpop.f32.mrf.mxu0  ;;  %v739_v34 = vpop.f32.mrf.mxu1 }
 0x11c   : > { %v884_v55 = vmax.f32 %v546_v33, 0.0  ;;  %v886_v54 = vmax.f32 %v739_v34, 0.0  ;;  %v981_v22 = vpack.c.bf16 %v881_v53, %v877_v60  ;;  %v983_v33 = vpack.c.bf16 %v883_v52, %v879_v8 }
 0x11d   : > { %v548_v35 = vpop.f32.mrf.mxu0  ;;  %v741_v40 = vpop.f32.mrf.mxu1  ;;  %v857_v34 = vmax.f32 %v2745_v4, 0.0  ;;  %v863_v8 = vmax.f32 %v2758_v10, 0.0  ;;  %v864_v4 = vmax.f32 %v2760_v11, 0.0  ;;  %v3684_v10 = vmax.f32 %v2764_v13, 0.0  ;;  %v1066_v11 = vld [vmem:[%s3640_s3 + $0x70] sm:$0xff] }
 0x11e   : > { %v885_v36 = vmax.f32 %v548_v35, 0.0  ;;  %v887_v44 = vmax.f32 %v741_v40, 0.0  ;;  %v860_v13 = vmax.f32 %v2749_v6, 0.0  ;;  %1156 = vperm.xlu0 %2344, %v1066_v11  }
 0x11f   : > { %v550_v47 = vpop.f32.mrf.mxu0  ;;  %v743_v48 = vpop.f32.mrf.mxu1 }
 0x120   : > { %v888_v29 = vmax.f32 %v550_v47, 0.0  ;;  %v890_v28 = vmax.f32 %v743_v48, 0.0 }
 0x121   : > { %v552_v37 = vpop.f32.mrf.mxu0  ;;  %v745_v41 = vpop.f32.mrf.mxu1 }
 0x122   : > { %v889_v43 = vmax.f32 %v552_v37, 0.0  ;;  %v891_v45 = vmax.f32 %v745_v41, 0.0  ;;  %v984_v47 = vpack.c.bf16 %v888_v29, %v884_v55  ;;  %v986_v48 = vpack.c.bf16 %v890_v28, %v886_v54 }
 0x123   : > { %v556_v61 = vpop.f32.mrf.mxu0  ;;  %v749_v49 = vpop.f32.mrf.mxu1  ;;  %v872_v37 = vmax.f32 %v2772_v19, 0.0  ;;  %v868_v41 = vmax.f32 %v2768_v15, 0.0 }
 0x124   : > { %v985_v17 = vpack.c.bf16 %v889_v43, %v885_v36  ;;  %v987_v18 = vpack.c.bf16 %v891_v45, %v887_v44  ;;  %v876_v36 = vmax.f32 %v2776_v23, 0.0  ;;  %v878_v43 = vmax.f32 %v2778_v24, 0.0 }
 0x125   : > { %v558_v35 = vpop.f32.mrf.mxu0  ;;  %v751_v40 = vpop.f32.mrf.mxu1  ;;  %v892_v28 = vmax.f32 %v556_v61, 0.0  ;;  %v894_v29 = vmax.f32 %v749_v49, 0.0  ;;  %v859_v61 = vmax.f32 %v2747_v5, 0.0  ;;  %v870_v44 = vmax.f32 %v2770_v16, 0.0 }
 0x126   : > { %1404 = vmatprep.subr.bf16.mxu0 %v985_v17  ;;  %1597 = vmatprep.subr.bf16.mxu1 %v987_v18  ;;  %v980_v53 = vpack.c.bf16 %v880_v31, %v876_v36  ;;  %v982_v52 = vpack.c.bf16 %v882_v32, %v878_v43  ;;  %v893_v60 = vmax.f32 %v558_v35, 0.0  ;;  %v895_v19 = vmax.f32 %v751_v40, 0.0 }
 0x127   : > { %v560_v27 = vpop.f32.mrf.mxu0  ;;  %v753_v30 = vpop.f32.mrf.mxu1  ;;  %1405 = vmatpush1.bf16.msra.mxu0 %v984_v47  ;;  %1598 = vmatpush1.bf16.msra.mxu1 %v986_v48  ;;  %v861_v49 = vmax.f32 %v2756_v9, 0.0  ;;  %v866_v5 = vmax.f32 %v2762_v12, 0.0  ;;  %v976_v15 = vpack.c.bf16 %v872_v37, %v868_v41  ;;  %v978_v16 = vpack.c.bf16 %v874_v21, %v870_v44  ;;  %v1064_v12 = vld [vmem:[%s3640_s3 + $0x60] sm:$0xff] }
 0x128   : > { %v896_v54 = vmax.f32 %v560_v27, 0.0  ;;  %v898_v55 = vmax.f32 %v753_v30, 0.0  ;;  %1406 = vmatprep.subr.bf16.mxu0 %v981_v22  ;;  %1599 = vmatprep.subr.bf16.mxu1 %v983_v33  ;;  %v856_v47 = vmax.f32 %v2741_v2, 0.0  ;;  %v858_v9 = vmax.f32 %v2743_v3, 0.0 }
 0x129   : > { %v562_v39 = vpop.f32.mrf.mxu0  ;;  %v755_v38 = vpop.f32.mrf.mxu1  ;;  %v973_v48 = vpack.c.bf16 %v3684_v10, %v861_v49  ;;  %v3685_v35 = vmax.f32 %v2766_v14, 0.0  ;;  %v3686_v37 = vmax.f32 %v2737_v0, 0.0  ;;  %v3687_v2 = vmax.f32 %v2739_v1, 0.0  ;;  %1146 = vperm.xlu1 %2345, %v1064_v12  }
 0x12a   : > { %v2796_v42 = vpack.c.bf16 %v896_v54, %v892_v28  ;;  %v2798_v20 = vpack.c.bf16 %v898_v55, %v894_v29  ;;  %v897_v23 = vmax.f32 %v562_v39, 0.0  ;;  %v899_v24 = vmax.f32 %v755_v38, 0.0 }
 0x12b   : > { %v566_v45 = vpop.f32.mrf.mxu0  ;;  %v759_v46 = vpop.f32.mrf.mxu1  ;;  %1407 = vmatpush1.bf16.msra.mxu0 %v980_v53  ;;  %1600 = vmatpush1.bf16.msra.mxu1 %v982_v52  ;;  %v975_v40 = vpack.c.bf16 %v3685_v35, %v863_v8  ;;  %v969_v21 = vpack.c.bf16 %v857_v34, %v3686_v37  ;;  %v971_v3 = vpack.c.bf16 %v859_v61, %v3687_v2  ;;  %v862_v22 = vmax.f32 %v2751_v7, 0.0  ;;  %v1067_v53 = vld [vmem:[%s3640_s3 + $0x78] sm:$0xff] }
 0x12c   : > { %3680 = vst [vmem:[#allocation20_spill] sm:$0xff] %v2796_v42  ;;  %3681 = vst [vmem:[#allocation21_spill] sm:$0xff] %v2798_v20  ;;  %v2806_v17 = vpack.c.bf16 %v897_v23, %v893_v60  ;;  %v2808_v18 = vpack.c.bf16 %v899_v24, %v895_v19  ;;  %1408 = vmatprep.subr.bf16.mxu0 %v977_v25  ;;  %1601 = vmatprep.subr.bf16.mxu1 %v979_v26  ;;  %v900_v25 = vmax.f32 %v566_v45, 0.0 }
 0x12d   : > { %v568_v31 = vpop.f32.mrf.mxu0  ;;  %v761_v32 = vpop.f32.mrf.mxu1  ;;  %v902_v26 = vmax.f32 %v759_v46, 0.0  ;;  %v972_v27 = vpack.c.bf16 %v864_v4, %v860_v13  ;;  %v974_v0 = vpack.c.bf16 %v866_v5, %v862_v22  ;;  %v852_v52 = vmax.f32 %v2733_v62, 0.0  ;;  %1161 = vperm.xlu0 %2344, %v1067_v53   ;;  %v3694_v46 = vld [vmem:[#allocation18_spill] sm:$0xff]  ;;  %v3696_v4 = vld [vmem:[#allocation19_spill] sm:$0xff] }
 0x12e   : > { %3682 = vst [vmem:[#allocation22_spill] sm:$0xff] %v2806_v17  ;;  %3683 = vst [vmem:[#allocation23_spill] sm:$0xff] %v2808_v18  ;;  %v901_v30 = vmax.f32 %v568_v31, 0.0  ;;  %v903_v28 = vmax.f32 %v761_v32, 0.0  ;;  %v854_v60 = vmax.f32 %v2735_v63, 0.0  ;;  %v845_v38 = vmax.f32 %v2721_v56, 0.0 }
 0x12f   : > { %v570_v14 = vpop.f32.mrf.mxu0  ;;  %v763_v33 = vpop.f32.mrf.mxu1  ;;  %1409 = vmatpush1.bf16.msra.mxu0 %v976_v15  ;;  %1602 = vmatpush1.bf16.msra.mxu1 %v978_v16  ;;  %v847_v23 = vmax.f32 %v2723_v57, 0.0  ;;  %v848_v62 = vmax.f32 %v2725_v58, 0.0  ;;  %v850_v63 = vmax.f32 %v2727_v59, 0.0  ;;  %v968_v61 = vpack.c.bf16 %v856_v47, %v852_v52  ;;  %v1065_v58 = vld [vmem:[%s3640_s3 + $0x68] sm:$0xff]  ;;  %v1062_v59 = vld [vmem:[%s3640_s3 + $0x50] sm:$0xff]  ;;  %v3698_v16 = vld [vmem:[#allocation16_spill] sm:$0xff] }
 0x130   : > { %v904_v36 = vmax.f32 %v570_v14, 0.0  ;;  %v906_v43 = vmax.f32 %v763_v33, 0.0  ;;  %1410 = vmatprep.subr.bf16.mxu0 %v973_v48  ;;  %1603 = vmatprep.subr.bf16.mxu1 %v975_v40  ;;  %v970_v41 = vpack.c.bf16 %v858_v9, %v854_v60  ;;  %v841_v56 = vmax.f32 %v2709_v50, 0.0  ;;  %v3699_v32 = vld [vmem:[#allocation17_spill] sm:$0xff]  ;;  %v3700_v9 = vld [vmem:[#allocation12_spill] sm:$0xff]  ;;  %v1058_v53 = vld [vmem:[%s3640_s3 + $0x30] sm:$0xff] }
 0x131   : > { %v572_v1 = vpop.f32.mrf.mxu0  ;;  %v765_v29 = vpop.f32.mrf.mxu1  ;;  %v843_v57 = vmax.f32 %v2711_v51, 0.0  ;;  %v3695_v49 = vmax.f32 %v3694_v46, 0.0  ;;  %v3697_v5 = vmax.f32 %v3696_v4, 0.0  ;;  %v844_v31 = vmax.f32 %v3698_v16, 0.0  ;;  %v3701_v48 = vld [vmem:[#allocation13_spill] sm:$0xff]  ;;  %1151 = vperm.xlu1 %2345, %v1065_v58   ;;  %1136 = vperm.xlu0 %2344, %v1062_v59   ;;  %v1063_v33 = vld [vmem:[%s3640_s3 + $0x58] sm:$0xff] }
 0x132   : > { %v2830_v6 = vpack.c.bf16 %v904_v36, %v900_v25  ;;  %v2832_v7 = vpack.c.bf16 %v906_v43, %v902_v26  ;;  %v905_v54 = vmax.f32 %v572_v1, 0.0  ;;  %v907_v55 = vmax.f32 %v765_v29, 0.0  ;;  %v1060_v25 = vld [vmem:[%s3640_s3 + $0x40] sm:$0xff]  ;;  %v3704_v43 = vld [vmem:[#allocation6_spill] sm:$0xff] }
 0x133   : > { %v2839_v19 = vpop.f32.mrf.mxu0  ;;  %v2841_v39 = vpop.f32.mrf.mxu1  ;;  %1411 = vmatpush1.bf16.msra.mxu0 %v972_v27  ;;  %1604 = vmatpush1.bf16.msra.mxu1 %v974_v0  ;;  %v965_v8 = vpack.c.bf16 %v3695_v49, %v845_v38  ;;  %v967_v15 = vpack.c.bf16 %v3697_v5, %v847_v23  ;;  %v846_v50 = vmax.f32 %v3699_v32, 0.0  ;;  %v837_v10 = vmax.f32 %v3700_v9, 0.0  ;;  %v3705_v0 = vld [vmem:[#allocation7_spill] sm:$0xff]  ;;  %v3706_v38 = vld [vmem:[#allocation14_spill] sm:$0xff] }
 0x134   : > { %3688 = vst [vmem:[#allocation24_spill] sm:$0xff] %v2830_v6  ;;  %3689 = vst [vmem:[#allocation25_spill] sm:$0xff] %v2832_v7  ;;  %v2845_v24 = vpack.c.bf16 %v905_v54, %v901_v30  ;;  %v2847_v34 = vpack.c.bf16 %v907_v55, %v903_v28  ;;  %1412 = vmatprep.subr.bf16.mxu0 %v969_v21  ;;  %1605 = vmatprep.subr.bf16.mxu1 %v971_v3  ;;  %v839_v35 = vmax.f32 %v3701_v48, 0.0  ;;  %v3702_v21 = vld [vmem:[#allocation8_spill] sm:$0xff]  ;;  %v3703_v3 = vld [vmem:[#allocation9_spill] sm:$0xff] }
 0x135   : > { %3690 = vst [vmem:[#allocation26_spill] sm:$0xff] %v2839_v19  ;;  %3691 = vst [vmem:[#allocation27_spill] sm:$0xff] %v2841_v39  ;;  %v2851_v44 = vpop.f32.mrf.mxu0  ;;  %v2853_v45 = vpop.f32.mrf.mxu1  ;;  %v964_v40 = vpack.c.bf16 %v848_v62, %v844_v31  ;;  %v966_v11 = vpack.c.bf16 %v850_v63, %v846_v50  ;;  %v833_v2 = vmax.f32 %v3702_v21, 0.0  ;;  %v835_v13 = vmax.f32 %v3703_v3, 0.0  ;;  %1141 = vperm.xlu1 %2345, %v1063_v33   ;;  %v1061_v55 = vld [vmem:[%s3640_s3 + $0x48] sm:$0xff]  ;;  %v3707_v23 = vld [vmem:[#allocation15_spill] sm:$0xff] }
 0x136   : > { %3692 = vst [vmem:[#allocation28_spill] sm:$0xff] %v2845_v24  ;;  %3693 = vst [vmem:[#allocation29_spill] sm:$0xff] %v2847_v34  ;;  %v961_v22 = vpack.c.bf16 %v841_v56, %v837_v10  ;;  %v963_v14 = vpack.c.bf16 %v843_v57, %v839_v35  ;;  %v829_v27 = vmax.f32 %v3704_v43, 0.0  ;;  %v831_v30 = vmax.f32 %v3705_v0, 0.0  ;;  %1126 = vperm.xlu0 %2344, %v1060_v25   ;;  %v3708_v46 = vld [vmem:[#allocation10_spill] sm:$0xff]  ;;  %v3709_v49 = vld [vmem:[#allocation11_spill] sm:$0xff] }
 0x137   : > { %v2869_v47 = vpop.f32.mrf.mxu0  ;;  %v2871_v51 = vpop.f32.mrf.mxu1  ;;  %1413 = vmatpush1.bf16.msra.mxu0 %v968_v61  ;;  %1606 = vmatpush1.bf16.msra.mxu1 %v970_v41  ;;  %v1059_v61 = vld [vmem:[%s3640_s3 + $0x38] sm:$0xff]  ;;  %v1056_v41 = vld [vmem:[%s3640_s3 + $0x20] sm:$0xff]  ;;  %v1057_v5 = vld [vmem:[%s3640_s3 + $0x28] sm:$0xff] }
 0x138   : > { %1414 = vmatprep.subr.bf16.mxu0 %v965_v8  ;;  %1607 = vmatprep.subr.bf16.mxu1 %v967_v15  ;;  %v957_v29 = vpack.c.bf16 %v833_v2, %v829_v27  ;;  %v959_v54 = vpack.c.bf16 %v835_v13, %v831_v30  ;;  %v1054_v15 = vld [vmem:[%s3640_s3 + $0x10] sm:$0xff]  ;;  %v1055_v32 = vld [vmem:[%s3640_s3 + $0x18] sm:$0xff]  ;;  %v1052_v50 = vld [vmem:[%s3640_s3] sm:$0xff] }
 0x139   : > { %v2875_v12 = vpop.f32.mrf.mxu0  ;;  %v2877_v37 = vpop.f32.mrf.mxu1  ;;  %1131 = vperm.xlu1 %2345, %v1061_v55  }
 0x13a   : > { %1116 = vperm.xlu0 %2344, %v1058_v53   ;;  %v1082_v53 = vld [vmem:[%s3640_s3 + $0xf0] sm:$0xff] }
 0x13b   : > { %v2887_v26 = vpop.f32.mrf.mxu0  ;;  %v2889_v36 = vpop.f32.mrf.mxu1  ;;  %1415 = vmatpush1.bf16.msra.mxu0 %v964_v40  ;;  %1608 = vmatpush1.bf16.msra.mxu1 %v966_v11  ;;  %v1053_v40 = vld [vmem:[%s3640_s3 + $0x8] sm:$0xff] }
 0x13c   : > { %1416 = vmatprep.subr.bf16.mxu0 %v961_v22  ;;  %1609 = vmatprep.subr.bf16.mxu1 %v963_v14 }
 0x13d   : > { %v2893_v28 = vpop.f32.mrf.mxu0  ;;  %v2895_v1 = vpop.f32.mrf.mxu1  ;;  %1121 = vperm.xlu1 %2345, %v1059_v61  }
 0x13e   : > { %1106 = vperm.xlu0 %2344, %v1056_v41  }
 0x13f   : > { %v2903_v52 = vpop.f32.mrf.mxu0  ;;  %v2905_v60 = vpop.f32.mrf.mxu1  ;;  %1417 = vmatpush1.bf16.msra.mxu0 %v3706_v38  ;;  %1610 = vmatpush1.bf16.msra.mxu1 %v3707_v23 }
 0x140   : > { %1418 = vmatprep.subr.bf16.mxu0 %v957_v29  ;;  %1611 = vmatprep.subr.bf16.mxu1 %v959_v54 }
 0x141   : > { %v2909_v62 = vpop.f32.mrf.mxu0  ;;  %v2911_v63 = vpop.f32.mrf.mxu1  ;;  %1111 = vperm.xlu1 %2345, %v1057_v5  }
 0x142   : > { %1096 = vperm.xlu0 %2344, %v1054_v15  }
 0x143   : > { %v2919_v56 = vpop.f32.mrf.mxu0  ;;  %v2921_v57 = vpop.f32.mrf.mxu1  ;;  %1419 = vmatpush1.bf16.msra.mxu0 %v3708_v46  ;;  %1612 = vmatpush1.bf16.msra.mxu1 %v3709_v49 }
 0x145   : > { %v2925_v8 = vpop.f32.mrf.mxu0  ;;  %v2927_v4 = vpop.f32.mrf.mxu1  ;;  %1101 = vperm.xlu1 %2345, %v1055_v32  }
 0x146   : > { %1086 = vperm.xlu0 %2344, %v1052_v50  }
 0x147   : > { %v2935_v58 = vpop.f32.mrf.mxu0  ;;  %v2937_v59 = vpop.f32.mrf.mxu1 }
 0x149   : > { %v2939_v16 = vpop.f32.mrf.mxu0  ;;  %v2941_v31 = vpop.f32.mrf.mxu1  ;;  %1091 = vperm.xlu1 %2345, %v1053_v40  }
 0x14a   : > { %1236 = vperm.xlu0 %2344, %v1082_v53  }
 0x14b   : > { %v2949_v9 = vpop.f32.mrf.mxu0  ;;  %v2951_v10 = vpop.f32.mrf.mxu1 }
 0x14d   : > { %v2953_v48 = vpop.f32.mrf.mxu0  ;;  %v2955_v35 = vpop.f32.mrf.mxu1 }
 0x14f   : > { %v2960_v11 = vpop.f32.mrf.mxu0  ;;  %v2962_v21 = vpop.f32.mrf.mxu1 }
 0x151   : > { %v612_v2 = vpop.f32.mrf.mxu0  ;;  %v805_v3 = vpop.f32.mrf.mxu1 }
 0x153   : > { %v616_v13 = vpop.f32.mrf.mxu0  ;;  %v809_v22 = vpop.f32.mrf.mxu1 }
 0x155   : > { %v618_v14 = vpop.f32.mrf.mxu0  ;;  %v811_v33 = vpop.f32.mrf.mxu1 }
 0x156   : > { %v941_v17 = vmax.f32 %v618_v14, 0.0  ;;  %v943_v7 = vmax.f32 %v811_v33, 0.0  ;;  %v935_v14 = vmax.f32 %v2955_v35, 0.0  ;;  %v932_v35 = vmax.f32 %v2949_v9, 0.0 }
 0x157   : > { %v620_v25 = vpop.f32.mrf.mxu0  ;;  %v813_v43 = vpop.f32.mrf.mxu1  ;;  %v923_v9 = vmax.f32 %v2911_v63, 0.0  ;;  %v919_v63 = vmax.f32 %v2895_v1, 0.0  ;;  %v920_v33 = vmax.f32 %v2903_v52, 0.0  ;;  %v1074_v1 = vld [vmem:[%s3640_s3 + $0xb0] sm:$0xff]  ;;  %v916_v52 = vmax.f32 %v2887_v26, 0.0 }
 0x158   : > { %v944_v24 = vmax.f32 %v620_v25, 0.0  ;;  %v946_v39 = vmax.f32 %v813_v43, 0.0  ;;  %v922_v25 = vmax.f32 %v2905_v60, 0.0  ;;  %v918_v60 = vmax.f32 %v2889_v36, 0.0  ;;  %v1079_v36 = vld [vmem:[%s3640_s3 + $0xd8] sm:$0xff] }
 0x159   : > { %v622_v27 = vpop.f32.mrf.mxu0  ;;  %v815_v0 = vpop.f32.mrf.mxu1 }
 0x15a   : > { %v945_v61 = vmax.f32 %v622_v27, 0.0  ;;  %v947_v41 = vmax.f32 %v815_v0, 0.0  ;;  %v937_v27 = vmax.f32 %v612_v2, 0.0  ;;  %v939_v0 = vmax.f32 %v805_v3, 0.0 }
 0x15b   : > { %v626_v30 = vpop.f32.mrf.mxu0  ;;  %v819_v29 = vpop.f32.mrf.mxu1  ;;  %v934_v3 = vmax.f32 %v2951_v10, 0.0 }
 0x15c   : > { %v948_v42 = vmax.f32 %v626_v30, 0.0  ;;  %v950_v18 = vmax.f32 %v819_v29, 0.0  ;;  %v940_v30 = vmax.f32 %v616_v13, 0.0  ;;  %v942_v29 = vmax.f32 %v809_v22, 0.0 }
 0x15d   : > { %v628_v54 = vpop.f32.mrf.mxu0  ;;  %v821_v55 = vpop.f32.mrf.mxu1  ;;  %v921_v13 = vmax.f32 %v2909_v62, 0.0  ;;  %v917_v62 = vmax.f32 %v2893_v28, 0.0  ;;  %v1081_v28 = vld [vmem:[%s3640_s3 + $0xe8] sm:$0xff] }
 0x15e   : > { %v949_v32 = vmax.f32 %v628_v54, 0.0  ;;  %v951_v50 = vmax.f32 %v821_v55, 0.0  ;;  %v1080_v54 = vld [vmem:[%s3640_s3 + $0xe0] sm:$0xff] }
 0x15f   : > { %v630_v38 = vpop.f32.mrf.mxu0  ;;  %v823_v23 = vpop.f32.mrf.mxu1  ;;  %1226 = vperm.xlu0 %2344, %v1080_v54   ;;  %v1075_v54 = vld [vmem:[%s3640_s3 + $0xb8] sm:$0xff] }
 0x160   : > { %v952_v46 = vmax.f32 %v630_v38, 0.0  ;;  %v954_v49 = vmax.f32 %v823_v23, 0.0  ;;  %v1013_v38 = vpack.c.bf16 %v945_v61, %v941_v17  ;;  %v1015_v23 = vpack.c.bf16 %v947_v41, %v943_v7 }
 0x161   : > { %v632_v5 = vpop.f32.mrf.mxu0  ;;  %v825_v15 = vpop.f32.mrf.mxu1  ;;  %v938_v17 = vmax.f32 %v2962_v21, 0.0  ;;  %v929_v7 = vmax.f32 %v2939_v16, 0.0  ;;  %v928_v16 = vmax.f32 %v2935_v58, 0.0  ;;  %v924_v58 = vmax.f32 %v2919_v56, 0.0 }
 0x162   : > { %v953_v40 = vmax.f32 %v632_v5, 0.0  ;;  %v955_v20 = vmax.f32 %v825_v15, 0.0  ;;  %v1016_v19 = vpack.c.bf16 %v952_v46, %v948_v42  ;;  %v1018_v53 = vpack.c.bf16 %v954_v49, %v950_v18 }
 0x163   : > { %v936_v42 = vmax.f32 %v2960_v11, 0.0  ;;  %v1012_v18 = vpack.c.bf16 %v944_v24, %v940_v30  ;;  %v925_v24 = vmax.f32 %v2925_v8, 0.0  ;;  %v1010_v21 = vpack.c.bf16 %v938_v17, %v934_v3  ;;  %v1083_v8 = vld [vmem:[%s3640_s3 + $0xf8] sm:$0xff]  ;;  %v1068_v30 = vld [vmem:[%s3640_s3 + $0x80] sm:$0xff] }
 0x164   : > { %v1017_v6 = vpack.c.bf16 %v953_v40, %v949_v32  ;;  %v1019_v34 = vpack.c.bf16 %v955_v20, %v951_v50  ;;  %v933_v20 = vmax.f32 %v2953_v48, 0.0  ;;  %v1078_v48 = vld [vmem:[%s3640_s3 + $0xd0] sm:$0xff]  ;;  %v1004_v43 = vpack.c.bf16 %v928_v16, %v924_v58  ;;  %1241 = vperm.xlu1 %2345, %v1083_v8   ;;  %v2366_v17 = vld [vmem:[%s3639_s2] ss:$8 sps:$4 sm:$0xff]   ;;  %v2372_v3 = vld [vmem:[%s3639_s2 + $0x24] ss:$8 sps:$4 sm:$0xff]  }
 0x165   : > { %v1008_v11 = vpack.c.bf16 %v936_v42, %v932_v35  ;;  %1216 = vperm.xlu0 %2344, %v1078_v48   ;;  %v1005_v10 = vpack.c.bf16 %v929_v7, %v925_v24  ;;  %v913_v56 = vmax.f32 %v2875_v12, 0.0  ;;  %v1001_v61 = vpack.c.bf16 %v921_v13, %v917_v62  ;;  %v3711_v40 = vld [vmem:[#allocation27_spill] sm:$0xff]  ;;  %v3718_v7 = vld [vmem:[#allocation20_spill] sm:$0xff]  ;;  %v1069_v35 = vld [vmem:[%s3640_s3 + $0x88] sm:$0xff] }
 0x166   : > { %1420 = vmatprep.subr.bf16.mxu0 %v1017_v6  ;;  %1613 = vmatprep.subr.bf16.mxu1 %v1019_v34  ;;  %v1014_v6 = vpack.c.bf16 %v946_v39, %v942_v29  ;;  %v931_v34 = vmax.f32 %v2941_v31, 0.0  ;;  %v1009_v2 = vpack.c.bf16 %v937_v27, %v933_v20  ;;  %v927_v39 = vmax.f32 %v2927_v4, 0.0  ;;  %v1076_v4 = vld [vmem:[%s3640_s3 + $0xc0] sm:$0xff]  ;;  %v1077_v27 = vld [vmem:[%s3640_s3 + $0xc8] sm:$0xff]  ;;  %v3717_v42 = vld [vmem:[#allocation23_spill] sm:$0xff] }
 0x167   : > { %1421 = vmatpush2.bf16.msra.mxu0 %v1016_v19  ;;  %1614 = vmatpush2.bf16.msra.mxu1 %v1018_v53  ;;  %v1011_v19 = vpack.c.bf16 %v939_v0, %v935_v14  ;;  %v930_v31 = vmax.f32 %v2937_v59, 0.0  ;;  %v926_v59 = vmax.f32 %v2921_v57, 0.0  ;;  %v915_v57 = vmax.f32 %v2877_v37, 0.0  ;;  %v1070_v0 = vld [vmem:[%s3640_s3 + $0x90] sm:$0xff]  ;;  %v3714_v29 = vld [vmem:[#allocation24_spill] sm:$0xff]  ;;  %v3715_v20 = vld [vmem:[#allocation25_spill] sm:$0xff] }
 0x168   : > { %1422 = vmatprep.subr.bf16.mxu0 %v1013_v38  ;;  %1615 = vmatprep.subr.bf16.mxu1 %v1015_v23  ;;  %v1007_v22 = vpack.c.bf16 %v931_v34, %v927_v39  ;;  %v1003_v41 = vpack.c.bf16 %v923_v9, %v919_v63  ;;  %v909_v12 = vmax.f32 %v2851_v44, 0.0  ;;  %v911_v37 = vmax.f32 %v2853_v45, 0.0  ;;  %v1072_v44 = vld [vmem:[%s3640_s3 + $0xa0] sm:$0xff]  ;;  %v3710_v45 = vld [vmem:[#allocation26_spill] sm:$0xff]  ;;  %v2375_v39 = vld [vmem:[%s3639_s2 + $0x34] ss:$8 sps:$4 sm:$0xff]  }
 0x169   : > { %v1006_v55 = vpack.c.bf16 %v930_v31, %v926_v59  ;;  %1206 = vperm.xlu0 %2344, %v1076_v4   ;;  %v912_v46 = vmax.f32 %v2869_v47, 0.0  ;;  %v914_v49 = vmax.f32 %v2871_v51, 0.0  ;;  %v1000_v5 = vpack.c.bf16 %v920_v33, %v916_v52  ;;  %1231 = vperm.xlu1 %2345, %v1081_v28   ;;  %v3712_v38 = vld [vmem:[#allocation28_spill] sm:$0xff]  ;;  %v3713_v23 = vld [vmem:[#allocation29_spill] sm:$0xff]  ;;  %v3716_v14 = vld [vmem:[#allocation22_spill] sm:$0xff] }
 0x16a   : > { %v1002_v15 = vpack.c.bf16 %v922_v25, %v918_v60  ;;  %v997_v32 = vpack.c.bf16 %v913_v56, %v909_v12  ;;  %v999_v26 = vpack.c.bf16 %v915_v57, %v911_v37  ;;  %v908_v50 = vmax.f32 %v3710_v45, 0.0  ;;  %v3719_v34 = vld [vmem:[#allocation21_spill] sm:$0xff]  ;;  %v2371_v48 = vld [vmem:[%s3639_s2 + $0x10] ss:$8 sps:$4 sm:$0xff]   ;;  %v2393_v59 = vld [vmem:[%s3639_s2 + $0x94] ss:$8 sps:$4 sm:$0xff]  }
 0x16b   : > { %1423 = vmatpush2.bf16.msra.mxu0 %v1012_v18  ;;  %1616 = vmatpush2.bf16.msra.mxu1 %v1014_v6  ;;  %v910_v47 = vmax.f32 %v3711_v40, 0.0  ;;  %v1073_v18 = vld [vmem:[%s3640_s3 + $0xa8] sm:$0xff]  ;;  %v2072_v6 = vld [vmem:[#allocation2] sm:$0x1]  ;;  %v2377_v16 = vld [vmem:[%s3639_s2 + $0x30] ss:$8 sps:$4 sm:$0xff]  }
 0x16c   : > { %1424 = vmatprep.subr.bf16.mxu0 %v1009_v2  ;;  %1617 = vmatprep.subr.bf16.mxu1 %v1011_v19  ;;  %v996_v51 = vpack.c.bf16 %v912_v46, %v908_v50  ;;  %v2369_v2 = vld [vmem:[%s3639_s2 + $0x14] ss:$8 sps:$4 sm:$0xff]   ;;  %v2374_v24 = vld [vmem:[%s3639_s2 + $0x20] ss:$8 sps:$4 sm:$0xff]   ;;  %v2378_v31 = vld [vmem:[%s3639_s2 + $0x44] ss:$8 sps:$4 sm:$0xff]  }
 0x16d   : > { %1196 = vperm.xlu0 %2344, %v1074_v1   ;;  %v998_v53 = vpack.c.bf16 %v914_v49, %v910_v47  ;;  %1221 = vperm.xlu1 %2345, %v1079_v36   ;;  %v1071_v19 = vld [vmem:[%s3640_s3 + $0x98] sm:$0xff]  ;;  %v2384_v9 = vld [vmem:[%s3639_s2 + $0x64] ss:$8 sps:$4 sm:$0xff]   ;;  %v2392_v58 = vld [vmem:[%s3639_s2 + $0x80] ss:$8 sps:$4 sm:$0xff]  }
 0x16e   : > { %v2383_v13 = vld [vmem:[%s3639_s2 + $0x50] ss:$8 sps:$4 sm:$0xff]   ;;  %v2390_v4 = vld [vmem:[%s3639_s2 + $0x84] ss:$8 sps:$4 sm:$0xff]   ;;  %v2398_v33 = vld [vmem:[%s3639_s2 + $0xa0] ss:$8 sps:$4 sm:$0xff]  }
 0x16f   : > { %1425 = vmatpush2.bf16.msra.mxu0 %v1008_v11  ;;  %1618 = vmatpush2.bf16.msra.mxu1 %v1010_v21  ;;  %v2380_v11 = vld [vmem:[%s3639_s2 + $0x40] ss:$8 sps:$4 sm:$0xff]   ;;  %v2381_v21 = vld [vmem:[%s3639_s2 + $0x54] ss:$8 sps:$4 sm:$0xff]   ;;  %v2389_v8 = vld [vmem:[%s3639_s2 + $0x70] ss:$8 sps:$4 sm:$0xff]  }
 0x170   : > { %1426 = vmatprep.subr.bf16.mxu0 %v1005_v10  ;;  %1619 = vmatprep.subr.bf16.mxu1 %v1007_v22  ;;  %v2386_v10 = vld [vmem:[%s3639_s2 + $0x60] ss:$8 sps:$4 sm:$0xff]   ;;  %v2387_v22 = vld [vmem:[%s3639_s2 + $0x74] ss:$8 sps:$4 sm:$0xff]   ;;  %v2395_v62 = vld [vmem:[%s3639_s2 + $0x90] ss:$8 sps:$4 sm:$0xff]  }
 0x171   : > { %1186 = vperm.xlu0 %2344, %v1072_v44   ;;  %1211 = vperm.xlu1 %2345, %v1077_v27   ;;  %v2396_v63 = vld [vmem:[%s3639_s2 + $0xa4] ss:$8 sps:$4 sm:$0xff]   ;;  %v2399_v25 = vld [vmem:[%s3639_s2 + $0xb4] ss:$8 sps:$4 sm:$0xff]   ;;  %v2402_v56 = vld [vmem:[%s3639_s2 + $0xc0] ss:$8 sps:$4 sm:$0xff]  }
 0x172   : > { %v2407_v57 = vld [vmem:[%s3639_s2 + $0xd4] ss:$8 sps:$4 sm:$0xff]   ;;  %v2408_v28 = vld [vmem:[%s3639_s2 + $0xe0] ss:$8 sps:$4 sm:$0xff]   ;;  %v2411_v52 = vld [vmem:[%s3639_s2 + $0xf0] ss:$8 sps:$4 sm:$0xff]  }
 0x173   : > { %1427 = vmatpush2.bf16.msra.mxu0 %v1004_v43  ;;  %1620 = vmatpush2.bf16.msra.mxu1 %v1006_v55  ;;  %v2401_v43 = vld [vmem:[%s3639_s2 + $0xb0] ss:$8 sps:$4 sm:$0xff]   ;;  %v2404_v55 = vld [vmem:[%s3639_s2 + $0xc4] ss:$8 sps:$4 sm:$0xff]   ;;  %v2413_v1 = vld [vmem:[%s3639_s2 + $0xf4] ss:$8 sps:$4 sm:$0xff]  }
 0x174   : > { %1428 = vmatprep.subr.bf16.mxu0 %v1001_v61  ;;  %1621 = vmatprep.subr.bf16.mxu1 %v1003_v41  ;;  %v2405_v61 = vld [vmem:[%s3639_s2 + $0xd0] ss:$8 sps:$4 sm:$0xff]   ;;  %v2410_v41 = vld [vmem:[%s3639_s2 + $0xe4] ss:$8 sps:$4 sm:$0xff]  }
 0x175   : > { %1176 = vperm.xlu0 %2344, %v1070_v0   ;;  %1201 = vperm.xlu1 %2345, %v1075_v54  }
 0x177   : > { %1429 = vmatpush2.bf16.msra.mxu0 %v1000_v5  ;;  %1622 = vmatpush2.bf16.msra.mxu1 %v1002_v15 }
 0x178   : > { %1430 = vmatprep.subr.bf16.mxu0 %v997_v32  ;;  %1623 = vmatprep.subr.bf16.mxu1 %v999_v26 }
 0x179   : > { %1166 = vperm.xlu0 %2344, %v1068_v30   ;;  %1191 = vperm.xlu1 %2345, %v1073_v18  }
 0x17b   : > { %1431 = vmatpush2.bf16.msra.mxu0 %v996_v51  ;;  %1624 = vmatpush2.bf16.msra.mxu1 %v998_v53 }
 0x17c   : > { %1432 = vmatprep.subr.bf16.mxu0 %v3712_v38  ;;  %1625 = vmatprep.subr.bf16.mxu1 %v3713_v23 }
 0x17d   : > { %2075 = vperm.xlu0 %2344, %v2072_v6   ;;  %1181 = vperm.xlu1 %2345, %v1071_v19  }
 0x17f   : > { %1433 = vmatpush2.bf16.msra.mxu0 %v3714_v29  ;;  %1626 = vmatpush2.bf16.msra.mxu1 %v3715_v20 }
 0x180   : > { %1434 = vmatprep.subr.bf16.mxu0 %v3716_v14  ;;  %1627 = vmatprep.subr.bf16.mxu1 %v3717_v42 }
 0x181   : > { %1171 = vperm.xlu1 %2345, %v1069_v35  }
 0x183   : > { %1435 = vmatpush2.bf16.msra.mxu0 %v3718_v7  ;;  %1628 = vmatpush2.bf16.msra.mxu1 %v3719_v34 }
 0x186   : > { %1437 = vmatmul.mubr.bf16.vlgmr.msra.gmra.mxu0 %v2366_v17  ;;  %1630 = vmatmul.mubr.bf16.vlgmr.msra.gmra.mxu1 %v2366_v17 }
 0x187   : > { %1446 = vmatprep.mubr.bf16.mxu0 %v2369_v2  ;;  %1639 = vmatprep.mubr.bf16.mxu1 %v2369_v2 }
 0x18e   : > { %1447 = vmatmul.mubr.bf16.gmra.mxu0 %v2371_v48  ;;  %1640 = vmatmul.mubr.bf16.gmra.mxu1 %v2371_v48 }
 0x18f   : > { %1456 = vmatprep.mubr.bf16.mxu0 %v2372_v3  ;;  %1649 = vmatprep.mubr.bf16.mxu1 %v2372_v3 }
 0x196   : > { %1457 = vmatmul.mubr.bf16.gmra.mxu0 %v2374_v24  ;;  %1650 = vmatmul.mubr.bf16.gmra.mxu1 %v2374_v24 }
 0x197   : > { %1466 = vmatprep.mubr.bf16.mxu0 %v2375_v39  ;;  %1659 = vmatprep.mubr.bf16.mxu1 %v2375_v39 }
 0x199   : > { %v3143_v60 = vpop.permute.xlu0 %1156 }
 0x19e   : > { %1467 = vmatmul.mubr.bf16.gmra.mxu0 %v2377_v16  ;;  %1660 = vmatmul.mubr.bf16.gmra.mxu1 %v2377_v16 }
 0x19f   : > { %1476 = vmatprep.mubr.bf16.mxu0 %v2378_v31  ;;  %1669 = vmatprep.mubr.bf16.mxu1 %v2378_v31 }
 0x1a4   : > { %v3145_v12 = vpop.permute.xlu1 %1146 }
 0x1a6   : > { %1477 = vmatmul.mubr.bf16.gmra.mxu0 %v2380_v11  ;;  %1670 = vmatmul.mubr.bf16.gmra.mxu1 %v2380_v11 }
 0x1a7   : > { %1486 = vmatprep.mubr.bf16.mxu0 %v2381_v21  ;;  %1679 = vmatprep.mubr.bf16.mxu1 %v2381_v21 }
 0x1a8   : > { %v3147_v37 = vpop.permute.xlu0 %1161 }
 0x1ac   : > { %v3149_v46 = vpop.permute.xlu1 %1151  ;;  %v3151_v49 = vpop.permute.xlu0 %1136 }
 0x1ae   : > { %1487 = vmatmul.mubr.bf16.gmra.mxu0 %v2383_v13  ;;  %1680 = vmatmul.mubr.bf16.gmra.mxu1 %v2383_v13 }
 0x1af   : > { %1496 = vmatprep.mubr.bf16.mxu0 %v2384_v9  ;;  %1689 = vmatprep.mubr.bf16.mxu1 %v2384_v9 }
 0x1b0   : > { %v3153_v5 = vpop.permute.xlu1 %1141 }
 0x1b1   : > { %v3155_v15 = vpop.permute.xlu0 %1126 }
 0x1b4   : > { %v3157_v32 = vpop.permute.xlu1 %1131 }
 0x1b5   : > { %v3159_v26 = vpop.permute.xlu0 %1116 }
 0x1b6   : > { %1497 = vmatmul.mubr.bf16.gmra.mxu0 %v2386_v10  ;;  %1690 = vmatmul.mubr.bf16.gmra.mxu1 %v2386_v10 }
 0x1b7   : > { %1506 = vmatprep.mubr.bf16.mxu0 %v2387_v22  ;;  %1699 = vmatprep.mubr.bf16.mxu1 %v2387_v22 }
 0x1b8   : > { %v3161_v36 = vpop.permute.xlu1 %1121 }
 0x1b9   : > { %v3163_v44 = vpop.permute.xlu0 %1106 }
 0x1bc   : > { %v3165_v45 = vpop.permute.xlu1 %1111 }
 0x1bd   : > { %v1097_v50 = vpop.permute.xlu0 %1096 }
 0x1be   : > { %1507 = vmatmul.mubr.bf16.gmra.mxu0 %v2389_v8  ;;  %1700 = vmatmul.mubr.bf16.gmra.mxu1 %v2389_v8 }
 0x1bf   : > { %1516 = vmatprep.mubr.bf16.mxu0 %v2390_v4  ;;  %1709 = vmatprep.mubr.bf16.mxu1 %v2390_v4 }
 0x1c0   : > { %v1102_v40 = vpop.permute.xlu1 %1101 }
 0x1c1   : > { %v1087_v47 = vpop.permute.xlu0 %1086 }
 0x1c4   : > { %v1092_v27 = vpop.permute.xlu1 %1091 }
 0x1c6   : > { %1517 = vmatmul.mubr.bf16.gmra.mxu0 %v2392_v58  ;;  %1710 = vmatmul.mubr.bf16.gmra.mxu1 %v2392_v58 }
 0x1c7   : > { %1526 = vmatprep.mubr.bf16.mxu0 %v2393_v59  ;;  %1719 = vmatprep.mubr.bf16.mxu1 %v2393_v59 }
 0x1ce   : > { %1527 = vmatmul.mubr.bf16.gmra.mxu0 %v2395_v62  ;;  %1720 = vmatmul.mubr.bf16.gmra.mxu1 %v2395_v62 }
 0x1cf   : > { %1536 = vmatprep.mubr.bf16.mxu0 %v2396_v63  ;;  %1729 = vmatprep.mubr.bf16.mxu1 %v2396_v63 }
 0x1d6   : > { %1537 = vmatmul.mubr.bf16.gmra.mxu0 %v2398_v33  ;;  %1730 = vmatmul.mubr.bf16.gmra.mxu1 %v2398_v33 }
 0x1d7   : > { %1546 = vmatprep.mubr.bf16.mxu0 %v2399_v25  ;;  %1739 = vmatprep.mubr.bf16.mxu1 %v2399_v25 }
 0x1de   : > { %1547 = vmatmul.mubr.bf16.gmra.mxu0 %v2401_v43  ;;  %1740 = vmatmul.mubr.bf16.gmra.mxu1 %v2401_v43 }
 0x1df   : > { %1556 = vmatprep.mubr.bf16.mxu0 %v2404_v55  ;;  %1749 = vmatprep.mubr.bf16.mxu1 %v2404_v55 }
 0x1e6   : > { %1557 = vmatmul.mubr.bf16.gmra.mxu0 %v2402_v56  ;;  %1750 = vmatmul.mubr.bf16.gmra.mxu1 %v2402_v56 }
 0x1e7   : > { %1566 = vmatprep.mubr.bf16.mxu0 %v2407_v57  ;;  %1759 = vmatprep.mubr.bf16.mxu1 %v2407_v57 }
 0x1ee   : > { %1567 = vmatmul.mubr.bf16.gmra.mxu0 %v2405_v61  ;;  %1760 = vmatmul.mubr.bf16.gmra.mxu1 %v2405_v61 }
 0x1ef   : > { %1576 = vmatprep.mubr.bf16.mxu0 %v2410_v41  ;;  %1769 = vmatprep.mubr.bf16.mxu1 %v2410_v41 }
 0x1f6   : > { %1577 = vmatmul.mubr.bf16.gmra.mxu0 %v2408_v28  ;;  %1770 = vmatmul.mubr.bf16.gmra.mxu1 %v2408_v28 }
 0x1f7   : > { %1586 = vmatprep.mubr.bf16.mxu0 %v2413_v1  ;;  %1779 = vmatprep.mubr.bf16.mxu1 %v2413_v1 }
 0x1fe   : > { %1587 = vmatmul.mubr.bf16.gmra.mxu0 %v2411_v52  ;;  %1780 = vmatmul.mubr.bf16.gmra.mxu1 %v2411_v52 }
 0x246   : > { %v1438_v51 = vpop.f32.mrf.mxu0  ;;  %v1631_v53 = vpop.f32.mrf.mxu1 }
 0x247   : > { %v1439_v0 = vadd.f32 %v1438_v51, %v1087_v47  ;;  %v1632_v38 = vadd.f32 %v1631_v53, %v1087_v47 }
 0x248   : > { %v1440_v23 = vpop.f32.mrf.mxu0  ;;  %v1633_v54 = vpop.f32.mrf.mxu1 }
 0x249   : > { %v1441_v30 = vadd.f32 %v1440_v23, %v1087_v47  ;;  %v1634_v29 = vadd.f32 %v1633_v54, %v1087_v47  ;;  %v1790_v18 = vmax.f32 %v1439_v0, 0.0  ;;  %v1792_v6 = vmax.f32 %v1632_v38, 0.0 }
 0x24a   : > { %v1442_v20 = vpop.f32.mrf.mxu0  ;;  %v1635_v14 = vpop.f32.mrf.mxu1 }
 0x24b   : > { %v1443_v42 = vadd.f32 %v1442_v20, %v1092_v27  ;;  %v1636_v17 = vadd.f32 %v1635_v14, %v1092_v27  ;;  %v1791_v3 = vmax.f32 %v1441_v30, 0.0  ;;  %v1793_v24 = vmax.f32 %v1634_v29, 0.0 }
 0x24c   : > { %v1444_v7 = vpop.f32.mrf.mxu0  ;;  %v1637_v34 = vpop.f32.mrf.mxu1 }
 0x24d   : > { %v1794_v2 = vmax.f32 %v1443_v42, 0.0  ;;  %v1796_v19 = vmax.f32 %v1636_v17, 0.0  ;;  %v1445_v48 = vadd.f32 %v1444_v7, %v1092_v27  ;;  %v1638_v35 = vadd.f32 %v1637_v34, %v1092_v27 }
 0x24e   : > { %v1448_v39 = vpop.f32.mrf.mxu0  ;;  %v1641_v16 = vpop.f32.mrf.mxu1 }
 0x24f   : > { %v3167_v31 = vpack.c.bf16 %v1794_v2, %v1790_v18  ;;  %v3169_v11 = vpack.c.bf16 %v1796_v19, %v1792_v6  ;;  %v1795_v21 = vmax.f32 %v1445_v48, 0.0  ;;  %v1797_v13 = vmax.f32 %v1638_v35, 0.0  ;;  %v3187_v6 = vpop.permute.xlu1 %1241 }
 0x250   : > { %v1449_v9 = vadd.f32 %v1448_v39, %v1097_v50  ;;  %v1642_v10 = vadd.f32 %v1641_v16, %v1097_v50  ;;  %v1450_v22 = vpop.f32.mrf.mxu0  ;;  %v1643_v8 = vpop.f32.mrf.mxu1  ;;  %3729 = vst [vmem:[#allocation7_spill] sm:$0xff] %v3187_v6 }
 0x251   : > { %3720 = vst [vmem:[#allocation18_spill] sm:$0xff] %v3167_v31  ;;  %3721 = vst [vmem:[#allocation19_spill] sm:$0xff] %v3169_v11  ;;  %v3171_v4 = vpack.c.bf16 %v1795_v21, %v1791_v3  ;;  %v3173_v58 = vpack.c.bf16 %v1797_v13, %v1793_v24  ;;  %v1451_v59 = vadd.f32 %v1450_v22, %v1097_v50 }
 0x252   : > { %v1644_v62 = vadd.f32 %v1643_v8, %v1097_v50  ;;  %v1452_v63 = vpop.f32.mrf.mxu0  ;;  %v1645_v33 = vpop.f32.mrf.mxu1  ;;  %v1798_v55 = vmax.f32 %v1449_v9, 0.0  ;;  %v1800_v56 = vmax.f32 %v1642_v10, 0.0  ;;  %v3202_v8 = vld [vmem:[%s3641_s4] sm:$0xff] }
 0x253   : > { %3722 = vst [vmem:[#allocation16_spill] sm:$0xff] %v3171_v4  ;;  %3723 = vst [vmem:[#allocation17_spill] sm:$0xff] %v3173_v58  ;;  %v1453_v25 = vadd.f32 %v1452_v63, %v1102_v40  ;;  %v1646_v43 = vadd.f32 %v1645_v33, %v1102_v40  ;;  %v1799_v47 = vmax.f32 %v1451_v59, 0.0  ;;  %v3191_v24 = vpop.permute.xlu1 %1231  ;;  %v2296_v33 = vcombine.high %v3202_v8, %v3202_v8 }
 0x254   : > { %v1454_v57 = vpop.f32.mrf.mxu0  ;;  %v1647_v61 = vpop.f32.mrf.mxu1  ;;  %v1801_v51 = vmax.f32 %v1644_v62, 0.0  ;;  %3731 = vst [vmem:[#allocation15_spill] sm:$0xff] %v3191_v24  ;;  %3733 = vst [vmem:[#allocation11_spill] sm:$0xff] %v3202_v8 }
 0x255   : > { %v1802_v41 = vmax.f32 %v1453_v25, 0.0  ;;  %v1804_v28 = vmax.f32 %v1646_v43, 0.0  ;;  %v1455_v1 = vadd.f32 %v1454_v57, %v1102_v40  ;;  %v1648_v52 = vadd.f32 %v1647_v61, %v1102_v40  ;;  %v3185_v40 = vpop.permute.xlu0 %1236  ;;  %2022 = vmatprep.mubr.bf16.mxu0 %v2296_v33  ;;  %2063 = vmatprep.mubr.bf16.mxu1 %v2296_v33 }
 0x256   : > { %v1458_v53 = vpop.f32.mrf.mxu0  ;;  %v3175_v27 = vpop.f32.mrf.mxu1  ;;  %3728 = vst [vmem:[#allocation6_spill] sm:$0xff] %v3185_v40 }
 0x257   : > { %v3177_v0 = vpack.c.bf16 %v1802_v41, %v1798_v55  ;;  %v3179_v50 = vpack.c.bf16 %v1804_v28, %v1800_v56  ;;  %v1803_v38 = vmax.f32 %v1455_v1, 0.0  ;;  %v1805_v23 = vmax.f32 %v1648_v52, 0.0  ;;  %v3204_v59 = vpop.permute.xlu1 %1221 }
 0x258   : > { %v1460_v54 = vpop.f32.mrf.mxu0  ;;  %v1653_v30 = vpop.f32.mrf.mxu1  ;;  %3734 = vst [vmem:[#allocation26_spill] sm:$0xff] %v3204_v59 }
 0x259   : > { %3724 = vst [vmem:[#allocation12_spill] sm:$0xff] %v3177_v0  ;;  %3725 = vst [vmem:[#allocation13_spill] sm:$0xff] %v3179_v50  ;;  %v3181_v29 = vpack.c.bf16 %v1803_v38, %v1799_v47  ;;  %v3183_v20 = vpack.c.bf16 %v1805_v23, %v1801_v51  ;;  %v3189_v48 = vpop.permute.xlu0 %1226  ;;  %v3239_v24 = vadd.f32 %v1460_v54, %v3163_v44 }
 0x25a   : > { %v1462_v14 = vpop.f32.mrf.mxu0  ;;  %v1655_v42 = vpop.f32.mrf.mxu1  ;;  %3730 = vst [vmem:[#allocation14_spill] sm:$0xff] %v3189_v48  ;;  %v3230_v48 = vadd.f32 %v1458_v53, %v3163_v44 }
 0x25b   : > { %3726 = vst [vmem:[#allocation8_spill] sm:$0xff] %v3181_v29  ;;  %3727 = vst [vmem:[#allocation9_spill] sm:$0xff] %v3183_v20  ;;  %v3216_v61 = vpop.permute.xlu1 %1211 }
 0x25c   : > { %v1464_v17 = vpop.f32.mrf.mxu0  ;;  %v1657_v18 = vpop.f32.mrf.mxu1  ;;  %3736 = vst [vmem:[#allocation28_spill] sm:$0xff] %v3216_v61  ;;  %3740 = vst [vmem:[#allocation22_spill] sm:$0xff] %v3230_v48 }
 0x25d   : > { %v3197_v9 = vpop.permute.xlu0 %1216  ;;  %v3219_v47 = vadd.f32 %v1464_v17, %v3165_v45  ;;  %v3224_v38 = vadd.f32 %v1657_v18, %v3165_v45  ;;  %v3242_v18 = vadd.f32 %v1653_v30, %v3163_v44 }
 0x25e   : > { %v1468_v7 = vpop.f32.mrf.mxu0  ;;  %v1661_v34 = vpop.f32.mrf.mxu1  ;;  %3732 = vst [vmem:[#allocation10_spill] sm:$0xff] %v3197_v9 }
 0x25f   : > { %3737 = vst [vmem:[#allocation29_spill] sm:$0xff] %v3219_v47  ;;  %3739 = vst [vmem:[#allocation25_spill] sm:$0xff] %v3224_v38  ;;  %v3236_v17 = vpop.permute.xlu1 %1201 }
 0x260   : > { %v1470_v2 = vpop.f32.mrf.mxu0  ;;  %v1663_v19 = vpop.f32.mrf.mxu1  ;;  %3741 = vst [vmem:[#allocation23_spill] sm:$0xff] %v3236_v17 }
 0x261   : > { %v3212_v55 = vpop.permute.xlu0 %1206  ;;  %v1471_v23 = vadd.f32 %v1470_v2, %v3159_v26  ;;  %v3233_v6 = vadd.f32 %v1663_v19, %v3159_v26  ;;  %v3251_v19 = vadd.f32 %v1462_v14, %v3165_v45 }
 0x262   : > { %v1472_v35 = vpop.f32.mrf.mxu0  ;;  %v1665_v3 = vpop.f32.mrf.mxu1  ;;  %3735 = vst [vmem:[#allocation27_spill] sm:$0xff] %v3212_v55 }
 0x263   : > { %v3245_v2 = vadd.f32 %v1472_v35, %v3161_v36  ;;  %v3248_v59 = vadd.f32 %v1665_v3, %v3161_v36  ;;  %3744 = vst [vmem:[#allocation30_spill] sm:$0xff] %v3251_v19  ;;  %v3262_v35 = vadd.f32 %v1468_v7, %v3159_v26  ;;  %v3265_v3 = vadd.f32 %v1661_v34, %v3159_v26  ;;  %v3290_v7 = vpop.permute.xlu1 %1191 }
 0x264   : > { %v1474_v39 = vpop.f32.mrf.mxu0  ;;  %v1667_v16 = vpop.f32.mrf.mxu1  ;;  %v1815_v55 = vmax.f32 %v1471_v23, 0.0  ;;  %3747 = vst [vmem:[#allocation33_spill] sm:$0xff] %v3290_v7 }
 0x265   : > { %v3221_v51 = vpop.permute.xlu0 %1196  ;;  %v1475_v40 = vadd.f32 %v1474_v39, %v3161_v36  ;;  %3742 = vst [vmem:[#allocation20_spill] sm:$0xff] %v3245_v2  ;;  %3743 = vst [vmem:[#allocation21_spill] sm:$0xff] %v3248_v59  ;;  %v3254_v39 = vadd.f32 %v1655_v42, %v3165_v45  ;;  %v3258_v61 = vadd.f32 %v1667_v16, %v3161_v36 }
 0x266   : > { %v3193_v21 = vpop.f32.mrf.mxu0  ;;  %v3195_v13 = vpop.f32.mrf.mxu1  ;;  %3738 = vst [vmem:[#allocation24_spill] sm:$0xff] %v3221_v51 }
 0x267   : > { %3745 = vst [vmem:[#allocation31_spill] sm:$0xff] %v3254_v39  ;;  %v1819_v45 = vmax.f32 %v1475_v40, 0.0 }
 0x268   : > { %v1480_v10 = vpop.f32.mrf.mxu0  ;;  %v1673_v22 = vpop.f32.mrf.mxu1 }
 0x269   : > { %v3269_v42 = vadd.f32 %v1480_v10, %v3155_v15  ;;  %v3272_v36 = vadd.f32 %v1673_v22, %v3155_v15  ;;  %v3274_v16 = vpop.permute.xlu0 %1186 }
 0x26a   : > { %v3206_v62 = vpop.f32.mrf.mxu0  ;;  %v3208_v63 = vpop.f32.mrf.mxu1  ;;  %3746 = vst [vmem:[#allocation32_spill] sm:$0xff] %v3274_v16  ;;  %v3306_v16 = vpack.c.bf16 %v1819_v45, %v1815_v55 }
 0x26c   : > { %v1484_v25 = vpop.f32.mrf.mxu0  ;;  %v1677_v43 = vpop.f32.mrf.mxu1  ;;  %3748 = vst [vmem:[#allocation34_spill] sm:$0xff] %v3306_v16 }
 0x26d   : > { %v3279_v26 = vadd.f32 %v1484_v25, %v3157_v32  ;;  %v3284_v10 = vadd.f32 %v1677_v43, %v3157_v32  ;;  %v3294_v25 = vadd.f32 %v3193_v21, %v3155_v15 }
 0x26e   : > { %v1488_v56 = vpop.f32.mrf.mxu0  ;;  %v3214_v57 = vpop.f32.mrf.mxu1 }
 0x26f   : > { %v3287_v22 = vadd.f32 %v1488_v56, %v3151_v49 }
 0x270   : > { %v1490_v41 = vpop.f32.mrf.mxu0  ;;  %v1683_v28 = vpop.f32.mrf.mxu1 }
 0x271   : > { %v1491_v51 = vadd.f32 %v1490_v41, %v3151_v49  ;;  %v3301_v30 = vadd.f32 %v1683_v28, %v3151_v49 }
 0x272   : > { %v1492_v1 = vpop.f32.mrf.mxu0  ;;  %v1685_v52 = vpop.f32.mrf.mxu1 }
 0x273   : > { %v3304_v43 = vadd.f32 %v1492_v1, %v3153_v5  ;;  %v3311_v21 = vadd.f32 %v1685_v52, %v3153_v5  ;;  %v3326_v52 = vadd.f32 %v3214_v57, %v3151_v49  ;;  %v1831_v11 = vmax.f32 %v1491_v51, 0.0  ;;  %v3343_v51 = vpop.permute.xlu1 %1181 }
 0x274   : > { %v1494_v33 = vpop.f32.mrf.mxu0  ;;  %v3227_v8 = vpop.f32.mrf.mxu1 }
 0x275   : > { %v1495_v34 = vadd.f32 %v1494_v33, %v3153_v5  ;;  %v3298_v33 = vadd.f32 %v3195_v13, %v3155_v15  ;;  %v3315_v15 = vadd.f32 %v3206_v62, %v3157_v32  ;;  %v3319_v13 = vadd.f32 %v3208_v63, %v3157_v32  ;;  %v3328_v62 = vpop.permute.xlu0 %1176 }
 0x276   : > { %v1498_v53 = vpop.f32.mrf.mxu0  ;;  %v1691_v9 = vpop.f32.mrf.mxu1  ;;  %v3337_v7 = vadd.f32 %v3227_v8, %v3153_v5 }
 0x277   : > { %v1835_v1 = vmax.f32 %v1495_v34, 0.0  ;;  %v3340_v49 = vadd.f32 %v1498_v53, %v3145_v12  ;;  %v1172_v47 = vpop.permute.xlu1 %1171 }
 0x278   : > { %v1500_v17 = vpop.f32.mrf.mxu0  ;;  %v1693_v14 = vpop.f32.mrf.mxu1 }
 0x279   : > { %v1501_v63 = vadd.f32 %v1500_v17, %v3145_v12  ;;  %v1694_v34 = vadd.f32 %v1693_v14, %v3145_v12  ;;  %v3345_v32 = vpack.c.bf16 %v1835_v1, %v1831_v11  ;;  %v3348_v17 = vadd.f32 %v1691_v9, %v3145_v12  ;;  %v1167_v0 = vpop.permute.xlu0 %1166 }
 0x27a   : > { %v1502_v23 = vpop.f32.mrf.mxu0  ;;  %v1695_v54 = vpop.f32.mrf.mxu1 }
 0x27b   : > { %v3351_v14 = vadd.f32 %v1502_v23, %v3149_v46  ;;  %v1839_v11 = vmax.f32 %v1501_v63, 0.0  ;;  %v1841_v1 = vmax.f32 %v1694_v34, 0.0 }
 0x27c   : > { %v1504_v56 = vpop.f32.mrf.mxu0  ;;  %v1697_v40 = vpop.f32.mrf.mxu1 }
 0x27d   : > { %v1505_v57 = vadd.f32 %v1504_v56, %v3149_v46  ;;  %v1698_v41 = vadd.f32 %v1697_v40, %v3149_v46  ;;  %v1696_v40 = vadd.f32 %v1695_v54, %v3149_v46 }
 0x27e   : > { %v1508_v55 = vpop.f32.mrf.mxu0  ;;  %v1701_v45 = vpop.f32.mrf.mxu1 }
 0x27f   : > { %v1509_v12 = vadd.f32 %v1508_v55, %v3143_v60  ;;  %v1702_v9 = vadd.f32 %v1701_v45, %v3143_v60  ;;  %v1843_v20 = vmax.f32 %v1505_v57, 0.0  ;;  %v1845_v29 = vmax.f32 %v1698_v41, 0.0 }
 0x280   : > { %v1510_v28 = vpop.f32.mrf.mxu0  ;;  %v1703_v58 = vpop.f32.mrf.mxu1  ;;  %v1844_v39 = vmax.f32 %v1696_v40, 0.0 }
 0x281   : > { %v1511_v8 = vadd.f32 %v1510_v28, %v3143_v60  ;;  %v1704_v53 = vadd.f32 %v1703_v58, %v3143_v60  ;;  %v1846_v59 = vmax.f32 %v1509_v12, 0.0  ;;  %v1848_v46 = vmax.f32 %v1702_v9, 0.0 }
 0x282   : > { %v1512_v31 = vpop.f32.mrf.mxu0  ;;  %v1705_v5 = vpop.f32.mrf.mxu1  ;;  %v1840_v9 = vmax.f32 %v3348_v17, 0.0 }
 0x283   : > { %v1513_v56 = vadd.f32 %v1512_v31, %v3147_v37  ;;  %v1706_v4 = vadd.f32 %v1705_v5, %v3147_v37  ;;  %v1842_v31 = vmax.f32 %v3351_v14, 0.0  ;;  %v1847_v55 = vmax.f32 %v1511_v8, 0.0 }
 0x284   : > { %v1514_v23 = vpop.f32.mrf.mxu0  ;;  %v1707_v50 = vpop.f32.mrf.mxu1  ;;  %v1849_v38 = vmax.f32 %v1704_v53, 0.0  ;;  %v1837_v53 = vmax.f32 %v3337_v7, 0.0 }
 0x285   : > { %v1515_v28 = vadd.f32 %v1514_v23, %v3147_v37  ;;  %v1708_v58 = vadd.f32 %v1707_v50, %v3147_v37  ;;  %v1850_v5 = vmax.f32 %v1513_v56, 0.0  ;;  %v1852_v63 = vmax.f32 %v1706_v4, 0.0 }
 0x286   : > { %v1518_v34 = vpop.f32.mrf.mxu0  ;;  %v1711_v48 = vpop.f32.mrf.mxu1  ;;  %v1943_v37 = vpack.c.bf16 %v1843_v20, %v1839_v11 }
 0x287   : > { %v1851_v60 = vmax.f32 %v1515_v28, 0.0  ;;  %v1853_v45 = vmax.f32 %v1708_v58, 0.0  ;;  %v1519_v54 = vadd.f32 %v1518_v34, %v1167_v0  ;;  %v1712_v57 = vadd.f32 %v1711_v48, %v1167_v0 }
 0x288   : > { %v1520_v2 = vpop.f32.mrf.mxu0  ;;  %v1713_v23 = vpop.f32.mrf.mxu1  ;;  %v1946_v41 = vpack.c.bf16 %v1850_v5, %v1846_v59  ;;  %v1948_v56 = vpack.c.bf16 %v1852_v63, %v1848_v46  ;;  %v1945_v28 = vpack.c.bf16 %v1845_v29, %v1841_v1  ;;  %v1838_v48 = vmax.f32 %v3340_v49, 0.0 }
 0x289   : > { %v1947_v50 = vpack.c.bf16 %v1851_v60, %v1847_v55  ;;  %v1949_v14 = vpack.c.bf16 %v1853_v45, %v1849_v38  ;;  %v1521_v4 = vadd.f32 %v1520_v2, %v1167_v0  ;;  %v1714_v19 = vadd.f32 %v1713_v23, %v1167_v0 }
 0x28a   : > { %v1522_v16 = vpop.f32.mrf.mxu0  ;;  %v1715_v8 = vpop.f32.mrf.mxu1  ;;  %v1854_v20 = vmax.f32 %v1519_v54, 0.0  ;;  %v1856_v11 = vmax.f32 %v1712_v57, 0.0  ;;  %v1942_v29 = vpack.c.bf16 %v1842_v31, %v1838_v48  ;;  %v1832_v45 = vmax.f32 %v3326_v52, 0.0 }
 0x28b   : > { %v1523_v58 = vadd.f32 %v1522_v16, %v1172_v47  ;;  %v1716_v12 = vadd.f32 %v1715_v8, %v1172_v47  ;;  %1990 = vmatprep.subr.bf16.mxu0 %v1947_v50  ;;  %2031 = vmatprep.subr.bf16.mxu1 %v1949_v14  ;;  %v1944_v16 = vpack.c.bf16 %v1844_v39, %v1840_v9  ;;  %v1855_v7 = vmax.f32 %v1521_v4, 0.0 }
 0x28c   : > { %v1524_v38 = vpop.f32.mrf.mxu0  ;;  %v1717_v59 = vpop.f32.mrf.mxu1  ;;  %1991 = vmatpush1.bf16.msra.mxu0 %v1946_v41  ;;  %2032 = vmatpush1.bf16.msra.mxu1 %v1948_v56  ;;  %v1857_v1 = vmax.f32 %v1714_v19, 0.0  ;;  %v3751_v46 = vmax.f32 %v3301_v30, 0.0  ;;  %v1826_v19 = vmax.f32 %v3315_v15, 0.0  ;;  %v1828_v23 = vmax.f32 %v3319_v13, 0.0 }
 0x28d   : > { %v1858_v0 = vmax.f32 %v1523_v58, 0.0  ;;  %v1860_v2 = vmax.f32 %v1716_v12, 0.0  ;;  %v1525_v40 = vadd.f32 %v1524_v38, %v1172_v47  ;;  %v1718_v5 = vadd.f32 %v1717_v59, %v1172_v47  ;;  %1992 = vmatprep.subr.bf16.mxu0 %v1943_v37  ;;  %2033 = vmatprep.subr.bf16.mxu1 %v1945_v28 }
 0x28e   : > { %v1528_v63 = vpop.f32.mrf.mxu0  ;;  %v1721_v49 = vpop.f32.mrf.mxu1  ;;  %v1941_v54 = vpack.c.bf16 %v1837_v53, %v3751_v46  ;;  %v3754_v30 = vmax.f32 %v3287_v22, 0.0  ;;  %v3755_v52 = vmax.f32 %v3304_v43, 0.0  ;;  %v3756_v41 = vmax.f32 %v3311_v21, 0.0 }
 0x28f   : > { %v3367_v34 = vpack.c.bf16 %v1858_v0, %v1854_v20  ;;  %v3369_v17 = vpack.c.bf16 %v1860_v2, %v1856_v11  ;;  %v1859_v55 = vmax.f32 %v1525_v40, 0.0  ;;  %v1861_v60 = vmax.f32 %v1718_v5, 0.0 }
 0x290   : > { %v1529_v47 = vadd.f32 %v1528_v63, %v3328_v62  ;;  %v1722_v31 = vadd.f32 %v1721_v49, %v3328_v62  ;;  %v1530_v39 = vpop.f32.mrf.mxu0  ;;  %v1723_v57 = vpop.f32.mrf.mxu1  ;;  %1993 = vmatpush1.bf16.msra.mxu0 %v1942_v29  ;;  %2034 = vmatpush1.bf16.msra.mxu1 %v1944_v16  ;;  %v1938_v14 = vpack.c.bf16 %v3755_v52, %v3754_v30  ;;  %v3757_v53 = vmax.f32 %v3269_v42, 0.0 }
 0x291   : > { %3749 = vst [vmem:[#allocation35_spill] sm:$0xff] %v3367_v34  ;;  %3750 = vst [vmem:[#allocation36_spill] sm:$0xff] %v3369_v17  ;;  %v3378_v37 = vpack.c.bf16 %v1859_v55, %v1855_v7  ;;  %v3380_v50 = vpack.c.bf16 %v1861_v60, %v1857_v1  ;;  %1994 = vmatprep.subr.bf16.mxu0 %v3345_v32  ;;  %v1940_v56 = vpack.c.bf16 %v3756_v41, %v1832_v45  ;;  %v3803_v17 = vld [vmem:[#allocation10_spill] sm:$0xff] }
 0x292   : > { %v1531_v4 = vadd.f32 %v1530_v39, %v3328_v62  ;;  %v1724_v15 = vadd.f32 %v1723_v57, %v3328_v62  ;;  %2035 = vmatprep.subr.bf16.mxu1 %v1941_v54  ;;  %v1532_v13 = vpop.f32.mrf.mxu0  ;;  %v1725_v8 = vpop.f32.mrf.mxu1  ;;  %v3758_v28 = vmax.f32 %v3279_v26, 0.0  ;;  %v3759_v22 = vmax.f32 %v3272_v36, 0.0  ;;  %v3772_v39 = vld [vmem:[#allocation20_spill] sm:$0xff]  ;;  %v3804_v34 = vld [vmem:[#allocation26_spill] sm:$0xff] }
 0x293   : > { %3752 = vst [vmem:[#allocation37_spill] sm:$0xff] %v3378_v37  ;;  %3753 = vst [vmem:[#allocation38_spill] sm:$0xff] %v3380_v50  ;;  %v3760_v43 = vmax.f32 %v3284_v10, 0.0  ;;  %v1533_v21 = vadd.f32 %v1532_v13, %v3343_v51  ;;  %v1726_v12 = vadd.f32 %v1725_v8, %v3343_v51  ;;  %v1822_v48 = vmax.f32 %v3294_v25, 0.0  ;;  %v3782_v8 = vld [vmem:[#allocation22_spill] sm:$0xff]  ;;  %v3805_v50 = vld [vmem:[#allocation15_spill] sm:$0xff] }
 0x294   : > { %v1935_v32 = vpack.c.bf16 %v3758_v28, %v3757_v53  ;;  %v1824_v62 = vmax.f32 %v3298_v33, 0.0  ;;  %v1862_v9 = vmax.f32 %v1529_v47, 0.0  ;;  %v1864_v20 = vmax.f32 %v1722_v31, 0.0  ;;  %v1534_v11 = vpop.f32.mrf.mxu0  ;;  %v1727_v42 = vpop.f32.mrf.mxu1  ;;  %1995 = vmatpush1.bf16.msra.mxu0 %v1938_v14  ;;  %2036 = vmatpush1.bf16.msra.mxu1 %v1940_v56  ;;  %v3778_v14 = vld [vmem:[#allocation29_spill] sm:$0xff] }
 0x295   : > { %v1937_v58 = vpack.c.bf16 %v3760_v43, %v3759_v22  ;;  %v1866_v26 = vmax.f32 %v1533_v21, 0.0  ;;  %v1868_v38 = vmax.f32 %v1726_v12, 0.0  ;;  %v1535_v36 = vadd.f32 %v1534_v11, %v3343_v51 }
 0x296   : > { %v1728_v10 = vadd.f32 %v1727_v42, %v3343_v51  ;;  %1996 = vmatprep.subr.bf16.mxu0 %v1935_v32  ;;  %v1934_v59 = vpack.c.bf16 %v1826_v19, %v1822_v48  ;;  %v1936_v0 = vpack.c.bf16 %v1828_v23, %v1824_v62  ;;  %v1863_v2 = vmax.f32 %v1531_v4, 0.0  ;;  %v3405_v40 = vpop.f32.mrf.mxu0  ;;  %v3407_v33 = vpop.f32.mrf.mxu1  ;;  %v3774_v23 = vld [vmem:[#allocation21_spill] sm:$0xff] }
 0x297   : > { %2037 = vmatprep.subr.bf16.mxu1 %v1937_v58  ;;  %v1865_v25 = vmax.f32 %v1724_v15, 0.0  ;;  %3761 = vst [vmem:[#allocation39_spill] sm:$0xff] %v3405_v40  ;;  %3762 = vst [vmem:[#allocation40_spill] sm:$0xff] %v3407_v33  ;;  %v3409_v5 = vpack.c.bf16 %v1866_v26, %v1862_v9  ;;  %v3411_v29 = vpack.c.bf16 %v1868_v38, %v1864_v20  ;;  %v1867_v16 = vmax.f32 %v1535_v36, 0.0  ;;  %v3780_v4 = vld [vmem:[#allocation25_spill] sm:$0xff]  ;;  %v3783_v9 = vld [vmem:[#allocation8_spill] sm:$0xff] }
 0x298   : > { %v1869_v7 = vmax.f32 %v1728_v10, 0.0  ;;  %v1652_v1 = vadd.f32 %v3175_v27, %v3163_v44  ;;  %v1814_v51 = vmax.f32 %v3262_v35, 0.0  ;;  %v1816_v63 = vmax.f32 %v3265_v3, 0.0  ;;  %v3421_v45 = vpop.f32.mrf.mxu0  ;;  %v3423_v46 = vpop.f32.mrf.mxu1  ;;  %1997 = vmatpush1.bf16.msra.mxu0 %v1934_v59  ;;  %2038 = vmatpush1.bf16.msra.mxu1 %v1936_v0  ;;  %v3769_v35 = vld [vmem:[#allocation34_spill] sm:$0xff]  ;;  %v3784_v20 = vld [vmem:[#allocation9_spill] sm:$0xff]  ;;  %v3785_v36 = vld [vmem:[#allocation12_spill] sm:$0xff] }
 0x299   : > { %3763 = vst [vmem:[#allocation41_spill] sm:$0xff] %v3409_v5  ;;  %3764 = vst [vmem:[#allocation42_spill] sm:$0xff] %v3411_v29  ;;  %v3765_v49 = vmax.f32 %v3233_v6, 0.0  ;;  %v3766_v55 = vmax.f32 %v3258_v61, 0.0  ;;  %v1807_v54 = vmax.f32 %v3239_v24, 0.0  ;;  %v1809_v47 = vmax.f32 %v3242_v18, 0.0  ;;  %1998 = vmatprep.subr.bf16.mxu0 %v3769_v35 }
 0x29a   : > { %v3427_v44 = vpack.c.bf16 %v1867_v16, %v1863_v2  ;;  %v3429_v27 = vpack.c.bf16 %v1869_v7, %v1865_v25  ;;  %v3770_v6 = vld [vmem:[#allocation30_spill] sm:$0xff]  ;;  %v3771_v61 = vld [vmem:[#allocation31_spill] sm:$0xff]  ;;  %v3773_v57 = vmax.f32 %v3772_v39, 0.0  ;;  %v3775_v30 = vmax.f32 %v3774_v23, 0.0  ;;  %v3438_v24 = vpop.f32.mrf.mxu0  ;;  %v3440_v18 = vpop.f32.mrf.mxu1  ;;  %v3786_v10 = vld [vmem:[#allocation13_spill] sm:$0xff] }
 0x29b   : > { %v1933_v60 = vpack.c.bf16 %v3766_v55, %v3765_v49  ;;  %v1810_v3 = vmax.f32 %v3770_v6, 0.0  ;;  %v1812_v31 = vmax.f32 %v3771_v61, 0.0  ;;  %3776 = vst [vmem:[#allocation34_spill] sm:$0xff] %v3438_v24  ;;  %3777 = vst [vmem:[#allocation30_spill] sm:$0xff] %v3440_v18  ;;  %v3779_v41 = vmax.f32 %v3778_v14, 0.0  ;;  %v3787_v59 = vld [vmem:[#allocation16_spill] sm:$0xff] }
 0x29c   : > { %3767 = vst [vmem:[#allocation43_spill] sm:$0xff] %v3427_v44  ;;  %3768 = vst [vmem:[#allocation44_spill] sm:$0xff] %v3429_v27  ;;  %v1930_v19 = vpack.c.bf16 %v3773_v57, %v1814_v51  ;;  %v1932_v52 = vpack.c.bf16 %v3775_v30, %v1816_v63  ;;  %v3781_v15 = vmax.f32 %v3780_v4, 0.0  ;;  %v1806_v53 = vmax.f32 %v3782_v8, 0.0  ;;  %v1544_v32 = vpop.f32.mrf.mxu0  ;;  %v1737_v22 = vpop.f32.mrf.mxu1  ;;  %v3788_v0 = vld [vmem:[#allocation17_spill] sm:$0xff]  ;;  %v3790_v51 = vld [vmem:[#allocation19_spill] sm:$0xff] }
 0x29d   : > { %2039 = vmatprep.subr.bf16.mxu1 %v1933_v60  ;;  %v1927_v56 = vpack.c.bf16 %v3779_v41, %v1807_v54  ;;  %v1808_v28 = vmax.f32 %v1652_v1, 0.0  ;;  %v3789_v1 = vld [vmem:[#allocation18_spill] sm:$0xff]  ;;  %v3791_v4 = vld [vmem:[#allocation32_spill] sm:$0xff]  ;;  %v3794_v8 = vld [vmem:[#allocation33_spill] sm:$0xff] }
 0x29e   : > { %v1929_v13 = vpack.c.bf16 %v3781_v15, %v1809_v47  ;;  %1999 = vmatpush1.bf16.msra.mxu0 %v1930_v19  ;;  %2040 = vmatpush1.bf16.msra.mxu1 %v1932_v52  ;;  %v1926_v43 = vpack.c.bf16 %v1810_v3, %v1806_v53  ;;  %v3447_v21 = vpop.f32.mrf.mxu0  ;;  %v3449_v12 = vpop.f32.mrf.mxu1  ;;  %v3477_v15 = vadd.f32 %v3421_v45, %v3791_v4  ;;  %v3800_v45 = vld [vmem:[#allocation23_spill] sm:$0xff] }
 0x29f   : > { %2000 = vmatprep.subr.bf16.mxu0 %v1927_v56  ;;  %v1928_v58 = vpack.c.bf16 %v1812_v31, %v1808_v28  ;;  %v3484_v53 = vadd.f32 %v1544_v32, %v3794_v8  ;;  %v3487_v28 = vadd.f32 %v1737_v22, %v3794_v8  ;;  %v3807_v44 = vld [vmem:[#allocation7_spill] sm:$0xff] }
 0x2a0   : > { %2041 = vmatprep.subr.bf16.mxu1 %v1929_v13  ;;  %v1550_v48 = vpop.f32.mrf.mxu0  ;;  %v1743_v62 = vpop.f32.mrf.mxu1  ;;  %3792 = vst [vmem:[#allocation31_spill] sm:$0xff] %v3477_v15  ;;  %v3481_v13 = vadd.f32 %v3423_v46, %v3791_v4  ;;  %v3808_v15 = vld [vmem:[#allocation14_spill] sm:$0xff] }
 0x2a1   : > { %3795 = vst [vmem:[#allocation21_spill] sm:$0xff] %v3484_v53  ;;  %3796 = vst [vmem:[#allocation29_spill] sm:$0xff] %v3487_v28 }
 0x2a2   : > { %2001 = vmatpush1.bf16.msra.mxu0 %v1926_v43  ;;  %2042 = vmatpush1.bf16.msra.mxu1 %v1928_v58  ;;  %v3453_v11 = vpop.f32.mrf.mxu0  ;;  %v3455_v42 = vpop.f32.mrf.mxu1  ;;  %3793 = vst [vmem:[#allocation20_spill] sm:$0xff] %v3481_v13 }
 0x2a3   : > { %2002 = vmatprep.subr.bf16.mxu0 %v3783_v9  ;;  %2043 = vmatprep.subr.bf16.mxu1 %v3784_v20  ;;  %v3797_v9 = vld [vmem:[#allocation24_spill] sm:$0xff] }
 0x2a4   : > { %v1554_v26 = vpop.f32.mrf.mxu0  ;;  %v1747_v38 = vpop.f32.mrf.mxu1  ;;  %v3490_v20 = vadd.f32 %v1550_v48, %v3797_v9 }
 0x2a5   : > { %v3499_v46 = vadd.f32 %v1747_v38, %v3800_v45 }
 0x2a6   : > { %2003 = vmatpush1.bf16.msra.mxu0 %v3785_v36  ;;  %2044 = vmatpush1.bf16.msra.mxu1 %v3786_v10  ;;  %v3461_v2 = vpop.f32.mrf.mxu0  ;;  %v3463_v25 = vpop.f32.mrf.mxu1  ;;  %3798 = vst [vmem:[#allocation25_spill] sm:$0xff] %v3490_v20  ;;  %v3493_v36 = vadd.f32 %v1743_v62, %v3797_v9  ;;  %v3496_v10 = vadd.f32 %v1554_v26, %v3800_v45 }
 0x2a7   : > { %2004 = vmatprep.subr.bf16.mxu0 %v3787_v59  ;;  %2045 = vmatprep.subr.bf16.mxu1 %v3788_v0  ;;  %v3801_v59 = vld [vmem:[#allocation27_spill] sm:$0xff]  ;;  %v3802_v0 = vld [vmem:[#allocation28_spill] sm:$0xff] }
 0x2a8   : > { %v1560_v16 = vpop.f32.mrf.mxu0  ;;  %v1753_v7 = vpop.f32.mrf.mxu1  ;;  %3799 = vst [vmem:[#allocation22_spill] sm:$0xff] %v3493_v36 }
 0x2a9   : > { %v3502_v32 = vadd.f32 %v1560_v16, %v3801_v59  ;;  %v3505_v22 = vadd.f32 %v1753_v7, %v3801_v59 }
 0x2aa   : > { %2005 = vmatpush1.bf16.msra.mxu0 %v3789_v1  ;;  %2046 = vmatpush1.bf16.msra.mxu1 %v3790_v51  ;;  %v3467_v63 = vpop.f32.mrf.mxu0  ;;  %v3469_v49 = vpop.f32.mrf.mxu1 }
 0x2ac   : > { %v1564_v55 = vpop.f32.mrf.mxu0  ;;  %v1757_v60 = vpop.f32.mrf.mxu1 }
 0x2ad   : > { %v3508_v1 = vadd.f32 %v1564_v55, %v3802_v0  ;;  %v3511_v48 = vadd.f32 %v1757_v60, %v3802_v0 }
 0x2ae   : > { %v3471_v54 = vpop.f32.mrf.mxu0  ;;  %v3473_v47 = vpop.f32.mrf.mxu1 }
 0x2b0   : > { %v1570_v35 = vpop.f32.mrf.mxu0  ;;  %v1763_v6 = vpop.f32.mrf.mxu1 }
 0x2b1   : > { %v3514_v26 = vadd.f32 %v1570_v35, %v3803_v17  ;;  %v3517_v38 = vadd.f32 %v1763_v6, %v3803_v17  ;;  %v3806_v6 = vld [vmem:[#allocation6_spill] sm:$0xff] }
 0x2b2   : > { %v1572_v3 = vpop.f32.mrf.mxu0  ;;  %v1765_v61 = vpop.f32.mrf.mxu1 }
 0x2b3   : > { %v3520_v16 = vadd.f32 %v1572_v3, %v3804_v34  ;;  %v3523_v7 = vadd.f32 %v1765_v61, %v3804_v34 }
 0x2b4   : > { %v1574_v31 = vpop.f32.mrf.mxu0  ;;  %v1767_v39 = vpop.f32.mrf.mxu1 }
 0x2b5   : > { %v3526_v55 = vadd.f32 %v1574_v31, %v3804_v34  ;;  %v3529_v60 = vadd.f32 %v1767_v39, %v3804_v34 }
 0x2b6   : > { %v1578_v57 = vpop.f32.mrf.mxu0  ;;  %v1771_v19 = vpop.f32.mrf.mxu1 }
 0x2b8   : > { %v1580_v23 = vpop.f32.mrf.mxu0  ;;  %v1773_v30 = vpop.f32.mrf.mxu1 }
 0x2b9   : > { %v1581_v31 = vadd.f32 %v1580_v23, %v3808_v15  ;;  %v1774_v33 = vadd.f32 %v1773_v30, %v3808_v15 }
 0x2ba   : > { %v1582_v52 = vpop.f32.mrf.mxu0  ;;  %v1775_v14 = vpop.f32.mrf.mxu1 }
 0x2bb   : > { %v1583_v40 = vadd.f32 %v1582_v52, %v3805_v50  ;;  %v1903_v18 = vmax.f32 %v1581_v31, 0.0  ;;  %v1885_v31 = vmax.f32 %v3499_v46, 0.0 }
 0x2bc   : > { %v1584_v41 = vpop.f32.mrf.mxu0  ;;  %v1777_v56 = vpop.f32.mrf.mxu1 }
 0x2bd   : > { %v1585_v37 = vadd.f32 %v1584_v41, %v3805_v50  ;;  %v1778_v35 = vadd.f32 %v1777_v56, %v3805_v50  ;;  %v1906_v24 = vmax.f32 %v1583_v40, 0.0  ;;  %v1563_v40 = vadd.f32 %v3467_v63, %v3802_v0 }
 0x2be   : > { %v1588_v43 = vpop.f32.mrf.mxu0  ;;  %v1781_v58 = vpop.f32.mrf.mxu1 }
 0x2bf   : > { %v1589_v34 = vadd.f32 %v1588_v43, %v3806_v6  ;;  %v1782_v39 = vadd.f32 %v1781_v58, %v3806_v6  ;;  %v1907_v4 = vmax.f32 %v1585_v37, 0.0  ;;  %v1579_v58 = vadd.f32 %v1578_v57, %v3808_v15 }
 0x2c0   : > { %v1590_v62 = vpop.f32.mrf.mxu0  ;;  %v1783_v51 = vpop.f32.mrf.mxu1  ;;  %v1569_v57 = vadd.f32 %v3471_v54, %v3803_v17  ;;  %v1898_v54 = vmax.f32 %v3520_v16, 0.0  ;;  %v1889_v16 = vmax.f32 %v3505_v22, 0.0  ;;  %v3809_v22 = vld [vmem:[#allocation34_spill] sm:$0xff] }
 0x2c1   : > { %v1591_v27 = vadd.f32 %v1590_v62, %v3806_v6  ;;  %v1784_v3 = vadd.f32 %v1783_v51, %v3806_v6  ;;  %v1776_v62 = vadd.f32 %v1775_v14, %v3805_v50  ;;  %v1772_v6 = vadd.f32 %v1771_v19, %v3808_v15 }
 0x2c2   : > { %v1592_v29 = vpop.f32.mrf.mxu0  ;;  %v1785_v5 = vpop.f32.mrf.mxu1  ;;  %v1910_v20 = vmax.f32 %v1589_v34, 0.0  ;;  %v1912_v52 = vmax.f32 %v1782_v39, 0.0  ;;  %v1905_v50 = vmax.f32 %v1774_v33, 0.0  ;;  %v1762_v33 = vadd.f32 %v3473_v47, %v3803_v17 }
 0x2c3   : > { %v1593_v13 = vadd.f32 %v1592_v29, %v3807_v44  ;;  %v1786_v61 = vadd.f32 %v1785_v5, %v3807_v44  ;;  %v1909_v5 = vmax.f32 %v1778_v35, 0.0  ;;  %v1911_v53 = vmax.f32 %v1591_v27, 0.0 }
 0x2c4   : > { %v1594_v41 = vpop.f32.mrf.mxu0  ;;  %v1787_v56 = vpop.f32.mrf.mxu1  ;;  %v1913_v30 = vmax.f32 %v1784_v3, 0.0  ;;  %v1901_v27 = vmax.f32 %v3529_v60, 0.0  ;;  %v1975_v3 = vpack.c.bf16 %v1907_v4, %v1903_v18  ;;  %v1902_v19 = vmax.f32 %v1579_v58, 0.0  ;;  %v3814_v58 = vld [vmem:[#allocation29_spill] sm:$0xff] }
 0x2c5   : > { %v1595_v51 = vadd.f32 %v1594_v41, %v3807_v44  ;;  %v1788_v29 = vadd.f32 %v1787_v56, %v3807_v44  ;;  %v1914_v28 = vmax.f32 %v1593_v13, 0.0  ;;  %v1916_v23 = vmax.f32 %v1786_v61, 0.0 }
 0x2c6   : > { %v1908_v44 = vmax.f32 %v1776_v62, 0.0  ;;  %v1899_v13 = vmax.f32 %v3526_v55, 0.0  ;;  %v1977_v61 = vpack.c.bf16 %v1909_v5, %v1905_v50  ;;  %v1904_v15 = vmax.f32 %v1772_v6, 0.0  ;;  %v3810_v62 = vld [vmem:[#allocation30_spill] sm:$0xff] }
 0x2c7   : > { %v1915_v36 = vmax.f32 %v1595_v51, 0.0  ;;  %v1917_v43 = vmax.f32 %v1788_v29, 0.0  ;;  %v1978_v37 = vpack.c.bf16 %v1914_v28, %v1910_v20  ;;  %v1980_v35 = vpack.c.bf16 %v1916_v23, %v1912_v52  ;;  %v3811_v51 = vld [vmem:[#allocation25_spill] sm:$0xff]  ;;  %v3812_v29 = vld [vmem:[#allocation22_spill] sm:$0xff] }
 0x2c8   : > { %v1895_v18 = vmax.f32 %v3514_v26, 0.0  ;;  %v1897_v4 = vmax.f32 %v3517_v38, 0.0  ;;  %v1900_v17 = vmax.f32 %v3523_v7, 0.0  ;;  %v1974_v47 = vpack.c.bf16 %v1906_v24, %v1902_v19 }
 0x2c9   : > { %v1979_v14 = vpack.c.bf16 %v1915_v36, %v1911_v53  ;;  %v1981_v41 = vpack.c.bf16 %v1917_v43, %v1913_v30  ;;  %v1756_v53 = vadd.f32 %v3469_v49, %v3802_v0  ;;  %v1976_v28 = vpack.c.bf16 %v1908_v44, %v1904_v15 }
 0x2ca   : > { %v1891_v20 = vmax.f32 %v3508_v1, 0.0  ;;  %v1893_v36 = vmax.f32 %v3511_v48, 0.0  ;;  %v1971_v63 = vpack.c.bf16 %v1899_v13, %v1895_v18  ;;  %v1973_v55 = vpack.c.bf16 %v1901_v27, %v1897_v4  ;;  %v3818_v27 = vld [vmem:[#allocation31_spill] sm:$0xff] }
 0x2cb   : > { %2006 = vmatprep.subr.bf16.mxu0 %v1979_v14  ;;  %2047 = vmatprep.subr.bf16.mxu1 %v1981_v41  ;;  %v1559_v49 = vadd.f32 %v3461_v2, %v3801_v59  ;;  %v1752_v0 = vadd.f32 %v3463_v25, %v3801_v59  ;;  %v1894_v26 = vmax.f32 %v1569_v57, 0.0  ;;  %v1896_v38 = vmax.f32 %v1762_v33, 0.0  ;;  %v3815_v14 = vld [vmem:[#allocation32_spill] sm:$0xff]  ;;  %v3816_v41 = vld [vmem:[#allocation39_spill] sm:$0xff] }
 0x2cc   : > { %2007 = vmatpush2.bf16.msra.mxu0 %v1978_v37  ;;  %2048 = vmatpush2.bf16.msra.mxu1 %v1980_v35  ;;  %v1553_v24 = vadd.f32 %v3453_v11, %v3800_v45  ;;  %v1746_v1 = vadd.f32 %v3455_v42, %v3800_v45  ;;  %v1887_v48 = vmax.f32 %v3502_v32, 0.0  ;;  %v1890_v2 = vmax.f32 %v1563_v40, 0.0 }
 0x2cd   : > { %2008 = vmatprep.subr.bf16.mxu0 %v1975_v3  ;;  %2049 = vmatprep.subr.bf16.mxu1 %v1977_v61  ;;  %v1892_v7 = vmax.f32 %v1756_v53, 0.0  ;;  %v1970_v60 = vpack.c.bf16 %v1898_v54, %v1894_v26  ;;  %v1972_v25 = vpack.c.bf16 %v1900_v17, %v1896_v38  ;;  %v1883_v59 = vmax.f32 %v3496_v10, 0.0  ;;  %v3819_v61 = vld [vmem:[#allocation20_spill] sm:$0xff]  ;;  %v3827_v38 = vld [vmem:[#allocation35_spill] sm:$0xff] }
 0x2ce   : > { %v1967_v34 = vpack.c.bf16 %v1891_v20, %v1887_v48  ;;  %v1969_v39 = vpack.c.bf16 %v1893_v36, %v1889_v16  ;;  %v1549_v11 = vadd.f32 %v3447_v21, %v3797_v9  ;;  %v1742_v42 = vadd.f32 %v3449_v12, %v3797_v9  ;;  %v3813_v9 = vld [vmem:[#allocation21_spill] sm:$0xff]  ;;  %v3821_v20 = vld [vmem:[#allocation44_spill] sm:$0xff] }
 0x2cf   : > { %v1886_v45 = vmax.f32 %v1559_v49, 0.0  ;;  %v1888_v32 = vmax.f32 %v1752_v0, 0.0  ;;  %v1543_v56 = vadd.f32 %v3809_v22, %v3794_v8  ;;  %v1736_v10 = vadd.f32 %v3810_v62, %v3794_v8  ;;  %v3817_v8 = vld [vmem:[#allocation40_spill] sm:$0xff]  ;;  %v3822_v36 = vld [vmem:[#allocation41_spill] sm:$0xff]  ;;  %v3825_v49 = vld [vmem:[#allocation38_spill] sm:$0xff] }
 0x2d0   : > { %2009 = vmatpush2.bf16.msra.mxu0 %v1974_v47  ;;  %2050 = vmatpush2.bf16.msra.mxu1 %v1976_v28  ;;  %v1879_v46 = vmax.f32 %v3811_v51, 0.0  ;;  %v1881_v5 = vmax.f32 %v3812_v29, 0.0  ;;  %v1882_v21 = vmax.f32 %v1553_v24, 0.0  ;;  %v1884_v23 = vmax.f32 %v1746_v1, 0.0  ;;  %v3820_v28 = vld [vmem:[#allocation43_spill] sm:$0xff]  ;;  %v3828_v24 = vld [vmem:[#allocation36_spill] sm:$0xff] }
 0x2d1   : > { %2010 = vmatprep.subr.bf16.mxu0 %v1971_v63  ;;  %2051 = vmatprep.subr.bf16.mxu1 %v1973_v55  ;;  %v1966_v30 = vpack.c.bf16 %v1890_v2, %v1886_v45  ;;  %v1968_v12 = vpack.c.bf16 %v1892_v7, %v1888_v32  ;;  %v1875_v43 = vmax.f32 %v3813_v9, 0.0  ;;  %v1877_v6 = vmax.f32 %v3814_v58, 0.0  ;;  %v3823_v63 = vld [vmem:[#allocation42_spill] sm:$0xff]  ;;  %v3824_v55 = vld [vmem:[#allocation37_spill] sm:$0xff]  ;;  %v3826_v0 = vld [vmem:[#allocation11_spill] sm:$0xff]  ;;  %v2076_v2 = vpop.permute.xlu0 %2075 }
 0x2d2   : > { %v1963_v52 = vpack.c.bf16 %v1883_v59, %v1879_v46  ;;  %v1965_v50 = vpack.c.bf16 %v1885_v31, %v1881_v5  ;;  %v1539_v44 = vadd.f32 %v3816_v41, %v3815_v14  ;;  %v1732_v37 = vadd.f32 %v3817_v8, %v3815_v14 }
 0x2d3   : > { %v1878_v35 = vmax.f32 %v1549_v11, 0.0  ;;  %v1880_v13 = vmax.f32 %v1742_v42, 0.0  ;;  %v1871_v3 = vmax.f32 %v3818_v27, 0.0  ;;  %v1873_v57 = vmax.f32 %v3819_v61, 0.0 }
 0x2d4   : > { %2011 = vmatpush2.bf16.msra.mxu0 %v1970_v60  ;;  %2052 = vmatpush2.bf16.msra.mxu1 %v1972_v25  ;;  %v1874_v33 = vmax.f32 %v1543_v56, 0.0  ;;  %v1876_v19 = vmax.f32 %v1736_v10, 0.0  ;;  %v1870_v4 = vmax.f32 %v1539_v44, 0.0  ;;  %v1872_v54 = vmax.f32 %v1732_v37, 0.0 }
 0x2d5   : > { %2012 = vmatprep.subr.bf16.mxu0 %v1967_v34  ;;  %2053 = vmatprep.subr.bf16.mxu1 %v1969_v39  ;;  %v1962_v15 = vpack.c.bf16 %v1882_v21, %v1878_v35  ;;  %v1964_v40 = vpack.c.bf16 %v1884_v23, %v1880_v13  ;;  %v1959_v53 = vpack.c.bf16 %v1875_v43, %v1871_v3  ;;  %v2078_v1 = vlaneseq }
 0x2d6   : > { %v1961_v18 = vpack.c.bf16 %v1877_v6, %v1873_v57  ;;  %v1958_v17 = vpack.c.bf16 %v1874_v33, %v1870_v4  ;;  %v1960_v47 = vpack.c.bf16 %v1876_v19, %v1872_v54  ;;  %v2295_v26 = vcombine.low %v3826_v0, %v3826_v0 }
 0x2d7   : > { %v2079_v48 = vshrl.u32 %v2078_v1, 7  ;;  %v2487_v62 = vmov 1966171168   ;;  %vm2125_vm2 = vcmp.lt.s32.totalorder %v2078_v1, 512 }
 0x2d8   : > { %2013 = vmatpush2.bf16.msra.mxu0 %v1966_v30  ;;  %2054 = vmatpush2.bf16.msra.mxu1 %v1968_v12  ;;  %v2101_v10 = vunpack.c.l.s4 %v2487_v62 }
 0x2d9   : > { %2014 = vmatprep.subr.bf16.mxu0 %v1963_v52  ;;  %2055 = vmatprep.subr.bf16.mxu1 %v1965_v50  ;;  %v2080_v16 = vsub.s32 0, %v2079_v48 }
 0x2da   : > { %v2102_v51 = vunpack.c.0.s8 %v2101_v10 }
 0x2db   : > { %v2081_v7 = vrot.slane %v2076_v2, %v2080_v16 }
 0x2dc   : > { %2015 = vmatpush2.bf16.msra.mxu0 %v1962_v15  ;;  %2056 = vmatpush2.bf16.msra.mxu1 %v1964_v40  ;;  %v2105_v23 = vsub.s32 %v2102_v51, %v2079_v48 }
 0x2dd   : > { %2016 = vmatprep.subr.bf16.mxu0 %v1959_v53  ;;  %2057 = vmatprep.subr.bf16.mxu1 %v1961_v18 }
 0x2e0   : > { %2017 = vmatpush2.bf16.msra.mxu0 %v1958_v17  ;;  %2058 = vmatpush2.bf16.msra.mxu1 %v1960_v47 }
 0x2e1   : > { %2018 = vmatprep.subr.bf16.mxu0 %v3820_v28  ;;  %2059 = vmatprep.subr.bf16.mxu1 %v3821_v20 }
 0x2e4   : > { %2019 = vmatpush2.bf16.msra.mxu0 %v3822_v36  ;;  %2060 = vmatpush2.bf16.msra.mxu1 %v3823_v63 }
 0x2e5   : > { %2020 = vmatprep.subr.bf16.mxu0 %v3824_v55  ;;  %2061 = vmatprep.subr.bf16.mxu1 %v3825_v49 }
 0x2e8   : > { %2021 = vmatpush2.bf16.msra.mxu0 %v3827_v38  ;;  %2062 = vmatpush2.bf16.msra.mxu1 %v3828_v24 }
 0x2eb   : > { %2023 = vmatmul.mubr.bf16.vlgmr.msra.gmra.mxu0 %v2295_v26  ;;  %2064 = vmatmul.mubr.bf16.vlgmr.msra.gmra.mxu1 %v2295_v26 }
 0x3ab   : > { %v2024_v60 = vpop.f32.mrf.mxu0  ;;  %v2065_v25 = vpop.f32.mrf.mxu1 }
 0x3ac   : > { %v2082_v59 = vadd.f32 %v2081_v7, %v2024_v60  ;;  %v2084_v31 = vadd.f32 %v2081_v7, %v2065_v25 }
 0x3ad   : > { %v2026_v34 = vpop.f32.mrf.mxu0  ;;  %v2067_v39 = vpop.f32.mrf.mxu1 }
 0x3ae   : > { %2416 = vtanh.f32 %v2082_v59  ;;  %v2083_v11 = vadd.f32 %v2081_v7, %v2026_v34  ;;  %v2085_v42 = vadd.f32 %v2081_v7, %v2067_v39 }
 0x3af   : > { %2418 = vtanh.f32 %v2084_v31  ;;  %v2028_v45 = vpop.f32.mrf.mxu0  ;;  %v2069_v32 = vpop.f32.mrf.mxu1 }
 0x3b0   : > { %2420 = vtanh.f32 %v2083_v11 }
 0x3b1   : > { %2422 = vtanh.f32 %v2085_v42  ;;  %v2029_v22 = vpop.f32.mrf.mxu0  ;;  %v2070_v56 = vpop.f32.mrf.mxu1 }
 0x3bb   : > { %v2417_v46 = vpop.eup %2416 }
 0x3bc   : > { %v2419_v29 = vpop.eup %2418  ;;  %v2090_v30 = vmul.f32 2.0, %v2417_v46 }
 0x3bd   : > { %v2421_v5 = vpop.eup %2420  ;;  %v2092_v9 = vmul.f32 2.0, %v2419_v29 }
 0x3be   : > { %v2423_v21 = vpop.eup %2422  ;;  %v2091_v12 = vmul.f32 2.0, %v2421_v5 }
 0x3bf   : > { %v2093_v43 = vmul.f32 2.0, %v2423_v21 }
 0x3c0   : > { %v2098_v58 = vcombine.low %v2090_v30, %v2091_v12 }
 0x3c1   : > { %v2099_v6 = vcombine.low %v2092_v9, %v2093_v43 }
 0x3c2   : > { %v2106_v52 = vrot.slane %v2098_v58, %v2105_v23 }
 0x3c3   : > { %v2113_v50 = vrot.slane %v2099_v6, %v2105_v23 }
 0x3c5   : > { %v2114_v14 = vcombine.low %v2106_v52, %v2113_v50 }
 0x3c7   : > { %v2121_v41 = vrot.slane %v2114_v14, %v2105_v23 }
 0x3c9   : > { %2127 = vst.msk [vmem:[%s247_s20] sm:$0xf] %vm2125_vm2, %v2121_v41 }
 0x3ca   : > { %2437 = shalt.err (!%p2434_p3)
}
 0x3cb   : > { %s2438_s13 = scalar_lea.hbm %s2141_s29, 64  ;;  %s2442_s16 = scalar_lea.hbm %s3643_s6, 128 }
 0x3cc   : > { %p2439_p4 = scmp.ne.s32.totalorder %s2141_s29, %s2438_s13  ;;  %p2443_p9 = scmp.lt.s32.totalorder %s2141_s29, %s3643_s6 }
 0x3cd   : > { %p2444_p10 = scmp.lt.s32.totalorder %s2442_s16, %s2438_s13 }
 0x3ce   : > { %p2440_p7 = pnand %p2439_p4, %p2565_p5 }
 0x3cf   : > { %p2445_p11 = por %p2444_p10, %p2443_p9 }
 0x3d0   : > { %p2441_p8 = pneg %p2440_p7 }
 0x3d2   : > { %p2446_p12 = pnand %p2445_p11, %p2441_p8 }
 0x3d4   : > { %2449 = shalt.err (!%p2446_p12)
}
 0x3d5   : > { %2303 = dma.vmem_to_hbm [thread:$0]  (%p2565_p5), %s2144_s21, 64, %s2141_s29, %s2129_s30  }
 0x3d6 PF: > { %p2309_p13 = scmp.ge.s32.totalorder %s2484_s26, 2  ;;  %s2155_s19 = sand.u32 1, %s2472_s23  }
 0x3d7   : > { %s2156_s20 = scalar_lea.sflag [#allocation4], %s2155_s19 }
 0x3d8   : > { %p2306_p0 = pnand %p2309_p13, %p2569_p6 }
 0x3da   : > { %p2307_p1 = pneg %p2306_p0 }
 0x3dc   : > { %2467 = dma.done.wait (%p2307_p1), %s2156_s20, 64  }
 0x3dd   : > { %2469 = vsyncadd (%p2307_p1), %s2156_s20, 4294967232  ;;  %p18_p2 = scmp.ge.s32.totalorder %s2552_s28, 4   ;;  %s3829_s23 = smov %s2476_s24 }
 0x3de   : > { %s3830_s24 = smov %s2480_s25  ;;  %s3831_s25 = smov %s2563_s7 }
 0x3df   : > { %s3832_s26 = smov %s2552_s28  ;;  %20 = sbr.rel (!%p18_p2) target bundleno = 6 (0x6), region = 79 }
 0x3e4   :  { %2161 = vsyncpa [#allocation4], 1 }
 0x3e5   :  { %2163 = vsyncpa [#allocation4 + $0x1], 1 }

</bundles_post_ra>
